<compile_context>
chip_gen: v5e
topology: v5e:2x2
jax: 0.10.0
libtpu: 0.0.40
codegen_flags: <defaults>
</compile_context>

<pallas_src>
import jax
import jax.numpy as jnp
from jax.experimental import pallas as pl
from jax.experimental.pallas import tpu as pltpu


def _fused_flow_kernel(x_ref, w1_ref, b1_ref, w2s_ref, b2s_ref,
                       w2t_ref, b2t_ref, y_ref, ld_ref):
    """One grid step == one coupling layer, operating on the resident y block.

    x_ref  : [B, D]        original input (read only at li == 0)
    w1_ref : [1, half, hid]   b1_ref : [1, 1, hid]
    w2s_ref: [1, hid, half]   b2s_ref: [1, 1, half]   (log-scale head)
    w2t_ref: [1, hid, half]   b2t_ref: [1, 1, half]   (translation head)
    y_ref  : [B, D]        resident activation / final output
    ld_ref : [B, 1]        resident log|det J| accumulator / final output
    """
    li = pl.program_id(0)
    half = y_ref.shape[1] // 2

    # ---- init: load x into the resident buffer, zero the log-det ----------
    @pl.when(li == 0)
    def _():
        y_ref[...] = x_ref[...]
        ld_ref[...] = jnp.zeros_like(ld_ref)

    w1 = w1_ref[0]
    b1 = b1_ref[0]
    w2s = w2s_ref[0]
    b2s = b2s_ref[0]
    w2t = w2t_ref[0]
    b2t = b2t_ref[0]

    def coupling(xa, xb):
        # conditioner MLP: tanh hidden layer, two linear heads (s, t)
        h = jnp.tanh(
            jnp.dot(xa, w1, preferred_element_type=jnp.float32) + b1)
        s = jnp.tanh(                      # bounded log-scale (RealNVP trick)
            jnp.dot(h, w2s, preferred_element_type=jnp.float32) + b2s)
        t = jnp.dot(h, w2t, preferred_element_type=jnp.float32) + b2t
        yb = xb * jnp.exp(s) + t
        return yb, jnp.sum(s, axis=1, keepdims=True)

    # ---- alternate which half is transformed, based on layer parity -------
    @pl.when(li % 2 == 0)
    def _():
        yb, ld = coupling(y_ref[:, :half], y_ref[:, half:])
        y_ref[:, half:] = yb
        ld_ref[...] += ld

    @pl.when(li % 2 == 1)
    def _():
        yb, ld = coupling(y_ref[:, half:], y_ref[:, :half])
        y_ref[:, :half] = yb
        ld_ref[...] += ld


def flow_sequential_forward(x, stacked_params):
    """Mirrors FlowSequential.forward(x, invert=False).

    Returns (y, log_det_jac) with y shaped like x (NCHW) and log_det_jac [B].
    """
    W1, B1, W2s, B2s, W2t, B2t = stacked_params
    Bsz, C, H, W = x.shape
    D = C * H * W
    half = D // 2
    L, _, hid = W1.shape
    xf = x.reshape(Bsz, D)

    resident = lambda li: (0, 0)          # same block across the layer axis
    per_layer = lambda li: (li, 0, 0)     # stream layer li's weights

    y, ld = pl.pallas_call(
        _fused_flow_kernel,
        out_shape=(jax.ShapeDtypeStruct((Bsz, D), x.dtype),
                   jax.ShapeDtypeStruct((Bsz, 1), jnp.float32)),
        grid=(L,),
        in_specs=[
            pl.BlockSpec((Bsz, D), resident),
            pl.BlockSpec((1, half, hid), per_layer),
            pl.BlockSpec((1, 1, hid), per_layer),
            pl.BlockSpec((1, hid, half), per_layer),
            pl.BlockSpec((1, 1, half), per_layer),
            pl.BlockSpec((1, hid, half), per_layer),
            pl.BlockSpec((1, 1, half), per_layer),
        ],
        out_specs=(pl.BlockSpec((Bsz, D), resident),
                   pl.BlockSpec((Bsz, 1), resident)),
        compiler_params=pltpu.CompilerParams(
            dimension_semantics=("arbitrary",)),   # sequential layer axis
    )(xf, W1, B1, W2s, B2s, W2t, B2t)

    return y.reshape(Bsz, C, H, W), ld[:, 0]


def init_flow_params(key, D, hidden, n_layers):
    """Deterministic synthetic parameters, stacked over layers and with the
    (s, t) head pre-split so the kernel never slices the st tensor."""
    half = D // 2
    W1, B1, W2s, B2s, W2t, B2t = [], [], [], [], [], []
    for _ in range(n_layers):
        k1, k2, k3, key = jax.random.split(key, 4)
        W1.append(jax.random.normal(k1, (half, hidden), jnp.float32) * 0.01)
        B1.append(jnp.zeros((1, hidden), jnp.float32))
        W2s.append(jax.random.normal(k2, (hidden, half), jnp.float32) * 0.01)
        B2s.append(jnp.zeros((1, half), jnp.float32))
        W2t.append(jax.random.normal(k3, (hidden, half), jnp.float32) * 0.01)
        B2t.append(jnp.zeros((1, half), jnp.float32))
    stack = lambda xs: jnp.stack(xs, axis=0)
    return (stack(W1), stack(B1), stack(W2s), stack(B2s),
            stack(W2t), stack(B2t))


def _reference_forward(x, stacked_params):
    """Pure-JAX reference, mirrors the PyTorch FlowSequential semantics."""
    W1, B1, W2s, B2s, W2t, B2t = stacked_params
    Bsz, C, H, W = x.shape
    D = C * H * W
    half = D // 2
    xf = x.reshape(Bsz, D)
    ld_total = jnp.zeros((Bsz,), jnp.float32)
    for li in range(W1.shape[0]):
        if li % 2 == 0:
            xa, xb = xf[:, :half], xf[:, half:]
        else:
            xa, xb = xf[:, half:], xf[:, :half]
        h = jnp.tanh(xa @ W1[li] + B1[li])
        s = jnp.tanh(h @ W2s[li] + B2s[li])
        t = h @ W2t[li] + B2t[li]
        yb = xb * jnp.exp(s) + t
        ld_total = ld_total + jnp.sum(s, axis=1)
        if li % 2 == 0:
            xf = jnp.concatenate([xa, yb], axis=1)
        else:
            xf = jnp.concatenate([yb, xa], axis=1)
    return xf.reshape(Bsz, C, H, W), ld_total


# TODO(synk): only forward (invert=False) is implemented; the inverse pass of
# FlowSequential (layer order reversed, affine inverted) is not needed here.

if __name__ == "__main__":
    key = jax.random.PRNGKey(0)
    kx, kp = jax.random.split(key)

    B, C, H, W = 2, 4, 16, 16          # NCHW, as in PyTorch
    hidden = 32
    n_layers = 4
    D = C * H * W

    x = jax.random.normal(kx, (B, C, H, W), jnp.float32)
    params = init_flow_params(kp, D, hidden, n_layers)

    fwd = jax.jit(lambda x: flow_sequential_forward(x, params))
    y, log_det = fwd(x)
    jax.block_until_ready((y, log_det))

    # sanity: shapes, finiteness, and agreement with the pure-JAX reference
    y_ref, ld_ref = _reference_forward(x, params)
    assert y.shape == (B, C, H, W)
    assert log_det.shape == (B,)
    assert jnp.all(jnp.isfinite(y)) and jnp.all(jnp.isfinite(log_det))
    assert jnp.allclose(y, y_ref, rtol=1e-5, atol=1e-5)
    assert jnp.allclose(log_det, ld_ref, rtol=1e-5, atol=1e-5)
    print("KERNEL_OK")
</pallas_src>

<mosaic_0001>
module attributes {stable_mosaic.version = 11 : i64} {
  func.func @_fused_flow_kernel(%arg0: i32, %arg1: memref<2x1024xf32, #tpu.memory_space<vmem>>, %arg2: memref<1x512x32xf32, #tpu.memory_space<vmem>>, %arg3: memref<1x1x32xf32, #tpu.memory_space<vmem>>, %arg4: memref<1x32x512xf32, #tpu.memory_space<vmem>>, %arg5: memref<1x1x512xf32, #tpu.memory_space<vmem>>, %arg6: memref<1x32x512xf32, #tpu.memory_space<vmem>>, %arg7: memref<1x1x512xf32, #tpu.memory_space<vmem>>, %arg8: memref<2x1024xf32, #tpu.memory_space<vmem>>, %arg9: memref<2x1xf32, #tpu.memory_space<vmem>>) attributes {dimension_semantics = [#tpu.dimension_semantics<arbitrary>], iteration_bounds = array<i64: 4>, scalar_prefetch = 0 : i64, scratch_operands = 0 : i64, tpu.core_type = #tpu.core_type<tc>, window_params = [{pipeline_mode = #tpu.pipeline_mode<synchronous>, transform_indices = @transform_0, window_bounds = array<i64: 2, 1024>}, {transform_indices = @transform_1, window_bounds = array<i64: 1, 512, 32>}, {transform_indices = @transform_2, window_bounds = array<i64: 1, 1, 32>}, {transform_indices = @transform_3, window_bounds = array<i64: 1, 32, 512>}, {transform_indices = @transform_4, window_bounds = array<i64: 1, 1, 512>}, {transform_indices = @transform_5, window_bounds = array<i64: 1, 32, 512>}, {transform_indices = @transform_6, window_bounds = array<i64: 1, 1, 512>}, {pipeline_mode = #tpu.pipeline_mode<synchronous>, transform_indices = @transform_7, window_bounds = array<i64: 2, 1024>}, {pipeline_mode = #tpu.pipeline_mode<synchronous>, transform_indices = @transform_8, window_bounds = array<i64: 2, 1>}]} {
    %c0_i32 = arith.constant 0 : i32
    %0 = arith.cmpi eq, %arg0, %c0_i32 : i32
    %1 = arith.extui %0 : i1 to i32
    %c0_i32_0 = arith.constant 0 : i32
    %2 = arith.cmpi ne, %1, %c0_i32_0 : i32
    scf.if %2 {
      %c0_32 = arith.constant 0 : index
      %c0_33 = arith.constant 0 : index
      %41 = vector.load %arg1[%c0_32, %c0_33] : memref<2x1024xf32, #tpu.memory_space<vmem>>, vector<2x1024xf32>
      %c0_34 = arith.constant 0 : index
      %c0_35 = arith.constant 0 : index
      %42 = vector.load %arg8[%c0_34, %c0_35] : memref<2x1024xf32, #tpu.memory_space<vmem>>, vector<2x1024xf32>
      tpu.vector_store %arg8[%c0_34, %c0_35], %41 {strides = array<i32>} : memref<2x1024xf32, #tpu.memory_space<vmem>>, vector<2x1024xf32>,
      %cst = arith.constant 0.000000e+00 : f32
      %43 = vector.broadcast %cst : f32 to vector<2x1xf32>
      %c0_36 = arith.constant 0 : index
      %c0_37 = arith.constant 0 : index
      %44 = vector.load %arg9[%c0_36, %c0_37] : memref<2x1xf32, #tpu.memory_space<vmem>>, vector<2x1xf32>
      tpu.vector_store %arg9[%c0_36, %c0_37], %43 {strides = array<i32>} : memref<2x1xf32, #tpu.memory_space<vmem>>, vector<2x1xf32>,
    } else {
    }
    %c0 = arith.constant 0 : index
    %c0_1 = arith.constant 0 : index
    %c0_2 = arith.constant 0 : index
    %3 = vector.load %arg2[%c0, %c0_1, %c0_2] : memref<1x512x32xf32, #tpu.memory_space<vmem>>, vector<1x512x32xf32>
    %4 = vector.shape_cast %3 : vector<1x512x32xf32> to vector<512x32xf32>
    %c0_3 = arith.constant 0 : index
    %c0_4 = arith.constant 0 : index
    %c0_5 = arith.constant 0 : index
    %5 = vector.load %arg3[%c0_3, %c0_4, %c0_5] : memref<1x1x32xf32, #tpu.memory_space<vmem>>, vector<1x1x32xf32>
    %6 = vector.shape_cast %5 : vector<1x1x32xf32> to vector<1x32xf32>
    %c0_6 = arith.constant 0 : index
    %c0_7 = arith.constant 0 : index
    %c0_8 = arith.constant 0 : index
    %7 = vector.load %arg4[%c0_6, %c0_7, %c0_8] : memref<1x32x512xf32, #tpu.memory_space<vmem>>, vector<1x32x512xf32>
    %8 = vector.shape_cast %7 : vector<1x32x512xf32> to vector<32x512xf32>
    %c0_9 = arith.constant 0 : index
    %c0_10 = arith.constant 0 : index
    %c0_11 = arith.constant 0 : index
    %9 = vector.load %arg5[%c0_9, %c0_10, %c0_11] : memref<1x1x512xf32, #tpu.memory_space<vmem>>, vector<1x1x512xf32>
    %10 = vector.shape_cast %9 : vector<1x1x512xf32> to vector<1x512xf32>
    %c0_12 = arith.constant 0 : index
    %c0_13 = arith.constant 0 : index
    %c0_14 = arith.constant 0 : index
    %11 = vector.load %arg6[%c0_12, %c0_13, %c0_14] : memref<1x32x512xf32, #tpu.memory_space<vmem>>, vector<1x32x512xf32>
    %12 = vector.shape_cast %11 : vector<1x32x512xf32> to vector<32x512xf32>
    %c0_15 = arith.constant 0 : index
    %c0_16 = arith.constant 0 : index
    %c0_17 = arith.constant 0 : index
    %13 = vector.load %arg7[%c0_15, %c0_16, %c0_17] : memref<1x1x512xf32, #tpu.memory_space<vmem>>, vector<1x1x512xf32>
    %14 = vector.shape_cast %13 : vector<1x1x512xf32> to vector<1x512xf32>
    %c2_i32 = arith.constant 2 : i32
    %c0_i32_18 = arith.constant 0 : i32
    %15 = arith.cmpi eq, %c2_i32, %c0_i32_18 : i32
    %c1_i32 = arith.constant 1 : i32
    %16 = arith.select %15, %c1_i32, %c2_i32 : i32
    %17 = arith.remsi %arg0, %16 : i32
    %c0_i32_19 = arith.constant 0 : i32
    %18 = arith.cmpi ne, %17, %c0_i32_19 : i32
    %c0_i32_20 = arith.constant 0 : i32
    %19 = arith.cmpi slt, %17, %c0_i32_20 : i32
    %c0_i32_21 = arith.constant 0 : i32
    %20 = arith.cmpi slt, %16, %c0_i32_21 : i32
    %21 = arith.xori %19, %20 : i1
    %22 = arith.andi %21, %18 : i1
    %23 = arith.addi %17, %16 : i32
    %24 = arith.select %22, %23, %17 : i32
    %c0_i32_22 = arith.constant 0 : i32
    %25 = arith.cmpi eq, %24, %c0_i32_22 : i32
    %26 = arith.extui %25 : i1 to i32
    %c0_i32_23 = arith.constant 0 : i32
    %27 = arith.cmpi ne, %26, %c0_i32_23 : i32
    scf.if %27 {
      %c0_32 = arith.constant 0 : index
      %c0_33 = arith.constant 0 : index
      %41 = vector.load %arg8[%c0_32, %c0_33] : memref<2x1024xf32, #tpu.memory_space<vmem>>, vector<2x512xf32>
      %c0_34 = arith.constant 0 : index
      %c512 = arith.constant 512 : index
      %42 = vector.load %arg8[%c0_34, %c512] : memref<2x1024xf32, #tpu.memory_space<vmem>>, vector<2x512xf32>
      %cst = arith.constant dense<0.000000e+00> : vector<2x32xf32>
      %43 = tpu.matmul %41, %4, %cst {dimension_numbers = #tpu.dot_dimension_numbers<[1], [0], [0], [1], [0, 0, 1, 1], [], []>} : vector<2x512xf32>, vector<512x32xf32>, vector<2x32xf32> -> vector<2x32xf32>
      %44 = vector.broadcast %6 : vector<1x32xf32> to vector<2x32xf32>
      %45 = arith.addf %43, %44 : vector<2x32xf32>
      %46 = math.tanh %45 : vector<2x32xf32>
      %cst_35 = arith.constant dense<0.000000e+00> : vector<2x512xf32>
      %47 = tpu.matmul %46, %8, %cst_35 {dimension_numbers = #tpu.dot_dimension_numbers<[1], [0], [0], [1], [0, 0, 1, 1], [], []>} : vector<2x32xf32>, vector<32x512xf32>, vector<2x512xf32> -> vector<2x512xf32>
      %48 = vector.broadcast %10 : vector<1x512xf32> to vector<2x512xf32>
      %49 = arith.addf %47, %48 : vector<2x512xf32>
      %50 = math.tanh %49 : vector<2x512xf32>
      %cst_36 = arith.constant dense<0.000000e+00> : vector<2x512xf32>
      %51 = tpu.matmul %46, %12, %cst_36 {dimension_numbers = #tpu.dot_dimension_numbers<[1], [0], [0], [1], [0, 0, 1, 1], [], []>} : vector<2x32xf32>, vector<32x512xf32>, vector<2x512xf32> -> vector<2x512xf32>
      %52 = vector.broadcast %14 : vector<1x512xf32> to vector<2x512xf32>
      %53 = arith.addf %51, %52 : vector<2x512xf32>
      %54 = math.exp %50 : vector<2x512xf32>
      %55 = arith.mulf %42, %54 : vector<2x512xf32>
      %56 = arith.addf %55, %53 : vector<2x512xf32>
      %cst_37 = arith.constant dense<0.000000e+00> : vector<2xf32>
      %57 = vector.multi_reduction <add>, %50, %cst_37 [1] : vector<2x512xf32> to vector<2xf32>
      %58 = vector.shape_cast %57 : vector<2xf32> to vector<2x1xf32>
      %c0_38 = arith.constant 0 : index
      %c512_39 = arith.constant 512 : index
      %59 = vector.load %arg8[%c0_38, %c512_39] : memref<2x1024xf32, #tpu.memory_space<vmem>>, vector<2x512xf32>
      tpu.vector_store %arg8[%c0_38, %c512_39], %56 {strides = array<i32>} : memref<2x1024xf32, #tpu.memory_space<vmem>>, vector<2x512xf32>,
      %c0_40 = arith.constant 0 : index
      %c0_41 = arith.constant 0 : index
      %60 = vector.load %arg9[%c0_40, %c0_41] : memref<2x1xf32, #tpu.memory_space<vmem>>, vector<2x1xf32>
      %61 = arith.addf %60, %58 : vector<2x1xf32>
      %c0_42 = arith.constant 0 : index
      %c0_43 = arith.constant 0 : index
      %62 = vector.load %arg9[%c0_42, %c0_43] : memref<2x1xf32, #tpu.memory_space<vmem>>, vector<2x1xf32>
      tpu.vector_store %arg9[%c0_42, %c0_43], %61 {strides = array<i32>} : memref<2x1xf32, #tpu.memory_space<vmem>>, vector<2x1xf32>,
    } else {
    }
    %c2_i32_24 = arith.constant 2 : i32
    %c0_i32_25 = arith.constant 0 : i32
    %28 = arith.cmpi eq, %c2_i32_24, %c0_i32_25 : i32
    %c1_i32_26 = arith.constant 1 : i32
    %29 = arith.select %28, %c1_i32_26, %c2_i32_24 : i32
    %30 = arith.remsi %arg0, %29 : i32
    %c0_i32_27 = arith.constant 0 : i32
    %31 = arith.cmpi ne, %30, %c0_i32_27 : i32
    %c0_i32_28 = arith.constant 0 : i32
    %32 = arith.cmpi slt, %30, %c0_i32_28 : i32
    %c0_i32_29 = arith.constant 0 : i32
    %33 = arith.cmpi slt, %29, %c0_i32_29 : i32
    %34 = arith.xori %32, %33 : i1
    %35 = arith.andi %34, %31 : i1
    %36 = arith.addi %30, %29 : i32
    %37 = arith.select %35, %36, %30 : i32
    %c1_i32_30 = arith.constant 1 : i32
    %38 = arith.cmpi eq, %37, %c1_i32_30 : i32
    %39 = arith.extui %38 : i1 to i32
    %c0_i32_31 = arith.constant 0 : i32
    %40 = arith.cmpi ne, %39, %c0_i32_31 : i32
    scf.if %40 {
      %c0_32 = arith.constant 0 : index
      %c512 = arith.constant 512 : index
      %41 = vector.load %arg8[%c0_32, %c512] : memref<2x1024xf32, #tpu.memory_space<vmem>>, vector<2x512xf32>
      %c0_33 = arith.constant 0 : index
      %c0_34 = arith.constant 0 : index
      %42 = vector.load %arg8[%c0_33, %c0_34] : memref<2x1024xf32, #tpu.memory_space<vmem>>, vector<2x512xf32>
      %cst = arith.constant dense<0.000000e+00> : vector<2x32xf32>
      %43 = tpu.matmul %41, %4, %cst {dimension_numbers = #tpu.dot_dimension_numbers<[1], [0], [0], [1], [0, 0, 1, 1], [], []>} : vector<2x512xf32>, vector<512x32xf32>, vector<2x32xf32> -> vector<2x32xf32>
      %44 = vector.broadcast %6 : vector<1x32xf32> to vector<2x32xf32>
      %45 = arith.addf %43, %44 : vector<2x32xf32>
      %46 = math.tanh %45 : vector<2x32xf32>
      %cst_35 = arith.constant dense<0.000000e+00> : vector<2x512xf32>
      %47 = tpu.matmul %46, %8, %cst_35 {dimension_numbers = #tpu.dot_dimension_numbers<[1], [0], [0], [1], [0, 0, 1, 1], [], []>} : vector<2x32xf32>, vector<32x512xf32>, vector<2x512xf32> -> vector<2x512xf32>
      %48 = vector.broadcast %10 : vector<1x512xf32> to vector<2x512xf32>
      %49 = arith.addf %47, %48 : vector<2x512xf32>
      %50 = math.tanh %49 : vector<2x512xf32>
      %cst_36 = arith.constant dense<0.000000e+00> : vector<2x512xf32>
      %51 = tpu.matmul %46, %12, %cst_36 {dimension_numbers = #tpu.dot_dimension_numbers<[1], [0], [0], [1], [0, 0, 1, 1], [], []>} : vector<2x32xf32>, vector<32x512xf32>, vector<2x512xf32> -> vector<2x512xf32>
      %52 = vector.broadcast %14 : vector<1x512xf32> to vector<2x512xf32>
      %53 = arith.addf %51, %52 : vector<2x512xf32>
      %54 = math.exp %50 : vector<2x512xf32>
      %55 = arith.mulf %42, %54 : vector<2x512xf32>
      %56 = arith.addf %55, %53 : vector<2x512xf32>
      %cst_37 = arith.constant dense<0.000000e+00> : vector<2xf32>
      %57 = vector.multi_reduction <add>, %50, %cst_37 [1] : vector<2x512xf32> to vector<2xf32>
      %58 = vector.shape_cast %57 : vector<2xf32> to vector<2x1xf32>
      %c0_38 = arith.constant 0 : index
      %c0_39 = arith.constant 0 : index
      %59 = vector.load %arg8[%c0_38, %c0_39] : memref<2x1024xf32, #tpu.memory_space<vmem>>, vector<2x512xf32>
      tpu.vector_store %arg8[%c0_38, %c0_39], %56 {strides = array<i32>} : memref<2x1024xf32, #tpu.memory_space<vmem>>, vector<2x512xf32>,
      %c0_40 = arith.constant 0 : index
      %c0_41 = arith.constant 0 : index
      %60 = vector.load %arg9[%c0_40, %c0_41] : memref<2x1xf32, #tpu.memory_space<vmem>>, vector<2x1xf32>
      %61 = arith.addf %60, %58 : vector<2x1xf32>
      %c0_42 = arith.constant 0 : index
      %c0_43 = arith.constant 0 : index
      %62 = vector.load %arg9[%c0_42, %c0_43] : memref<2x1xf32, #tpu.memory_space<vmem>>, vector<2x1xf32>
      tpu.vector_store %arg9[%c0_42, %c0_43], %61 {strides = array<i32>} : memref<2x1xf32, #tpu.memory_space<vmem>>, vector<2x1xf32>,
    } else {
    }
    return
  }
  func.func @transform_0(%arg0: i32) -> (i32, i32) {
    %c0_i32 = arith.constant 0 : i32
    %c0_i32_0 = arith.constant 0 : i32
    %c0_i32_1 = arith.constant 0 : i32
    return %c0_i32, %c0_i32_0 : i32, i32
  }
  func.func @transform_1(%arg0: i32) -> (i32, i32, i32) {
    %c0_i32 = arith.constant 0 : i32
    %c0_i32_0 = arith.constant 0 : i32
    %c0_i32_1 = arith.constant 0 : i32
    return %arg0, %c0_i32, %c0_i32_0 : i32, i32, i32
  }
  func.func @transform_2(%arg0: i32) -> (i32, i32, i32) {
    %c0_i32 = arith.constant 0 : i32
    %c0_i32_0 = arith.constant 0 : i32
    %c0_i32_1 = arith.constant 0 : i32
    return %arg0, %c0_i32, %c0_i32_0 : i32, i32, i32
  }
  func.func @transform_3(%arg0: i32) -> (i32, i32, i32) {
    %c0_i32 = arith.constant 0 : i32
    %c0_i32_0 = arith.constant 0 : i32
    %c0_i32_1 = arith.constant 0 : i32
    return %arg0, %c0_i32, %c0_i32_0 : i32, i32, i32
  }
  func.func @transform_4(%arg0: i32) -> (i32, i32, i32) {
    %c0_i32 = arith.constant 0 : i32
    %c0_i32_0 = arith.constant 0 : i32
    %c0_i32_1 = arith.constant 0 : i32
    return %arg0, %c0_i32, %c0_i32_0 : i32, i32, i32
  }
  func.func @transform_5(%arg0: i32) -> (i32, i32, i32) {
    %c0_i32 = arith.constant 0 : i32
    %c0_i32_0 = arith.constant 0 : i32
    %c0_i32_1 = arith.constant 0 : i32
    return %arg0, %c0_i32, %c0_i32_0 : i32, i32, i32
  }
  func.func @transform_6(%arg0: i32) -> (i32, i32, i32) {
    %c0_i32 = arith.constant 0 : i32
    %c0_i32_0 = arith.constant 0 : i32
    %c0_i32_1 = arith.constant 0 : i32
    return %arg0, %c0_i32, %c0_i32_0 : i32, i32, i32
  }
  func.func @transform_7(%arg0: i32) -> (i32, i32) {
    %c0_i32 = arith.constant 0 : i32
    %c0_i32_0 = arith.constant 0 : i32
    %c0_i32_1 = arith.constant 0 : i32
    return %c0_i32, %c0_i32_0 : i32, i32
  }
  func.func @transform_8(%arg0: i32) -> (i32, i32) {
    %c0_i32 = arith.constant 0 : i32
    %c0_i32_0 = arith.constant 0 : i32
    %c0_i32_1 = arith.constant 0 : i32
    return %c0_i32, %c0_i32_0 : i32, i32
  }
}

</mosaic_0001>

<bundles_post_ra>
// kernel: _lambda_.1
= control target key start
LH: loop header
LB: loop body
LE: loop exit
PB: predicated region body
PF: predicated region fallthrough
CT: control target
= control target key end

     0   :  { %s2419_s0 = inlined_call_operand.vmem [shape: f32[2,1024], index: 0, kind: input, shape index: {}]   ;;  %s2420_s1 = inlined_call_operand.hbm [shape: f32[4,512,32], index: 1, kind: input, shape index: {}]   ;;  %s2421_s2 = inlined_call_operand.vmem [shape: f32[4,1,32], index: 2, kind: input, shape index: {}]   ;;  %s2422_s3 = inlined_call_operand.hbm [shape: f32[4,32,512], index: 3, kind: input, shape index: {}]   ;;  %s2423_s4 = inlined_call_operand.vmem [shape: f32[4,1,512], index: 4, kind: input, shape index: {}, may-alias: {4,6}]   ;;  %s2424_s5 = inlined_call_operand.hbm [shape: f32[4,32,512], index: 5, kind: input, shape index: {}]   ;;  %s2425_s6 = inlined_call_operand.vmem [shape: f32[4,1,512], index: 6, kind: input, shape index: {}, may-alias: {4,6}]   ;;  %s2426_s7 = inlined_call_operand.vmem [shape: f32[2,1024], index: 7, kind: output, shape index: {0}]   ;;  %s2427_s8 = inlined_call_operand.vmem [shape: f32[2,1], index: 8, kind: output, shape index: {1}]  }
   0x1   :  { %2460 = sst [smem:[#allocation72_spill]] %s2422_s3 }
   0x2   :  { %14 = vsyncpa [#allocation3], 0 }
   0x3   :  { %16 = vsyncpa [#allocation3 + $0x1], 0 }
   0x4   :  { %17 = vsyncpa [#allocation5], 0 }
   0x5   :  { %19 = vsyncpa [#allocation5 + $0x1], 0  ;;  %s1667_s27 = smov 0   ;;  %s1669_s28 = smov 0  }
   0x6   :  { %s1671_s29 = smov 0   ;;  %s1673_s30 = smov 0  }
   0x7 LB: > { %2461 = sst [smem:[#allocation9_spill]] %s1611_s29  ;;  %s1686_s9 = sadd.s32 4294967295, %s1615_s30   ;;  %s1615_s30 = sphi %s1673_s30, %s2627_s30   ;;  %s1611_s29 = sphi %s1671_s29, %s2629_s29   ;;  %s1607_s28 = sphi %s1669_s28, %s2631_s28   ;;  %s1603_s27 = sphi %s1667_s27, %s2630_s27  }
   0x8   : > { %s1689_s10 = sadd.s32 1, %s1615_s30   ;;  %s53_s12 = sadd.s32 1, %s1611_s29 }
   0x9   : > { %2462 = sst [smem:[#allocation10_spill]] %s1689_s10  ;;  %s50_s11 = ssub.s32 %s1615_s30, %s1689_s10 }
   0xa   : > { %p51_p0 = scmp.eq.s32.totalorder %s50_s11, 0  ;;  %p60_p1 = scmp.ne.s32.totalorder %s1611_s29, %s1607_s28 }
   0xb   : > { %p61_p2 = scmp.eq.s32.totalorder %s1615_s30, 0  ;;  %p66_p3 = scmp.ne.s32.totalorder %s1607_s28, %s1603_s27 }
   0xc   : > { %s1699_s13 = scalar_select %p51_p0, %s1611_s29, %s53_s12  }
   0xd   : > { %p62_p4 = por %p61_p2, %p60_p1  ;;  %p67_p5 = scmp.eq.s32.totalorder %s1686_s9, 0 }
   0xe   : > { %2463 = sst [smem:[#allocation11_spill]] %s1699_s13  ;;  %p1413_p6 = scmp.lt.s32.totalorder %s1615_s30, 4 }
   0xf   : > { %p1703_p7 = por %p67_p5, %p66_p3  ;;  %s1708_s15 = sand.u32 1, %s1611_s29  }
  0x10   : > { %p1710_p8 = pnand %p1413_p6, %p62_p4  ;;  %s293_s17 = sand.u32 1, %s1615_s30  }
  0x11   : > { %s2428_s18 = sshll.u32 %s1708_s15, 7  ;;  %s1395_s19 = sshll.u32 %s1615_s30, 7 }
  0x12   : > { %s297_s20 = scalar_lea.vmem [#allocation4], %s2428_s18  ;;  %s2466_s3 = sld [smem:[#allocation72_spill]] }
  0x13   : > { %s305_s21 = sshll.u32 %s297_s20, 4  ;;  %s1722_s26 = scalar_lea.sflag [#allocation5], %s293_s17  ;;  %s306_s21 = int_to_ptr.vmem [resolvable:$true] %s305_s21 }
  0x14   : > { %p1491_p10 = pneg %p1710_p8 }
  0x18   : > { %s302_s24 = scalar_lea.hbm %s2466_s3, %s1395_s19  ;;  %s1494_s22 = scalar_lea.hbm %s2466_s3, 512 }
  0x19   : > { %s303_s25 = sshll.u32 %s302_s24, 4  ;;  %s304_s25 = int_to_ptr.hbm [resolvable:$true] %s303_s25 }
  0x1a   : > { %s1487_s27 = sshra.s32 %s304_s25, 4  ;;  %s1488_s27 = int_to_ptr.hbm [resolvable:$true] %s1487_s27 }
  0x1b   : > { %s1489_s11 = scalar_lea.hbm %s1488_s27, 128  ;;  %p1495_p13 = scmp.lt.s32.totalorder %s1488_s27, %s2466_s3 }
  0x1c   : > { %p1490_p9 = scmp.ne.s32.totalorder %s1488_s27, %s1489_s11  ;;  %p1496_p0 = scmp.lt.s32.totalorder %s1494_s22, %s1489_s11 }
  0x1e   : > { %p1492_p11 = pnand %p1491_p10, %p1490_p9  ;;  %p1497_p1 = por %p1496_p0, %p1495_p13 }
  0x20   : > { %p1493_p12 = pneg %p1492_p11 }
  0x22   : > { %p1498_p2 = pnand %p1497_p1, %p1493_p12 }
  0x24   : > { %1501 = shalt.err (!%p1498_p2)
}
  0x25   : > { %s2429_s17 = smov 512   ;;  %s2430_s24 = smov 32  }
  0x26   : > { %1409 = dma.hbm_to_vmem [thread:$0]  (!%p1710_p8), %s304_s25, 2048, %s306_s21, %s1722_s26, %s2429_s17, %s2429_s17, %s2430_s24  }
  0x27   : > { %s331_s11 = scalar_lea.hbm %s2424_s5, %s1395_s19  ;;  %s2467_s20 = sshll.u32 %s1708_s15, 7 }
  0x28   : > { %s332_s12 = sshll.u32 %s331_s11, 4  ;;  %s326_s22 = scalar_lea.vmem [#allocation6], %s2467_s20  ;;  %s1746_s12 = int_to_ptr.hbm [resolvable:$true] %s332_s12 }
  0x29   : > { %s334_s23 = sshll.u32 %s326_s22, 4  ;;  %p1364_p3 = scmp.ge.s32.totalorder %s1615_s30, 1  ;;  %s1748_s23 = int_to_ptr.vmem [resolvable:$true] %s334_s23 }
  0x2a   : > { %p349_p4 = scmp.lt.s32.totalorder %s1615_s30, 5  ;;  %s1355_s3 = sshll.u32 %s1708_s15, 9 }
  0x2b   : > { %s1394_s21 = sshll.u32 %s1615_s30, 9  ;;  %s269_s25 = scalar_lea.vmem [#allocation2], %s1355_s3 }
  0x2c   : > { %p1753_p5 = pnand %p1364_p3, %p349_p4  ;;  %s277_s19 = sshll.u32 %s269_s25, 4  ;;  %s278_s19 = int_to_ptr.vmem [resolvable:$true] %s277_s19 }
  0x2d   : > { %s274_s11 = scalar_lea.hbm %s2420_s1, %s1394_s21  ;;  %s266_s22 = scalar_lea.sflag [#allocation3], %s1708_s15 }
  0x2e   : > { %s275_s20 = sshll.u32 %s274_s11, 4  ;;  %s1524_s3 = scalar_lea.hbm %s2420_s1, 2048  ;;  %s276_s20 = int_to_ptr.hbm [resolvable:$true] %s275_s20 }
  0x2f   : > { %s1517_s17 = sshra.s32 %s276_s20, 4  ;;  %s1518_s17 = int_to_ptr.hbm [resolvable:$true] %s1517_s17 }
  0x30   : > { %s1519_s24 = scalar_lea.hbm %s1518_s17, 512  ;;  %p1525_p12 = scmp.lt.s32.totalorder %s1518_s17, %s2420_s1 }
  0x31   : > { %p1520_p6 = scmp.ne.s32.totalorder %s1518_s17, %s1519_s24  ;;  %p1526_p13 = scmp.lt.s32.totalorder %s1524_s3, %s1519_s24 }
  0x33   : > { %p1522_p9 = pnand %p1520_p6, %p1491_p10  ;;  %p1527_p0 = por %p1526_p13, %p1525_p12 }
  0x35   : > { %p1523_p11 = pneg %p1522_p9 }
  0x37   : > { %p1528_p1 = pnand %p1527_p0, %p1523_p11 }
  0x39   : > { %1531 = shalt.err (!%p1528_p1)
}
  0x3a   : > { %s1619_s15 = smov 128   ;;  %s1620_s21 = smov 8  }
  0x3b   : > { %1406 = dma.hbm_to_vmem [thread:$0]  (!%p1710_p8), %s276_s20, 8192, %s278_s19, %s266_s22, %s1619_s15, %s1619_s15, %s1620_s21  }
  0x3c   : > { %s1547_s18 = sshra.s32 %s1746_s12, 4  ;;  %s1554_s17 = scalar_lea.hbm %s2424_s5, 512  ;;  %s1548_s18 = int_to_ptr.hbm [resolvable:$true] %s1547_s18 }
  0x3d   : > { %s1549_s27 = scalar_lea.hbm %s1548_s18, 128  ;;  %p1555_p6 = scmp.lt.s32.totalorder %s1548_s18, %s2424_s5 }
  0x3e   : > { %p1550_p2 = scmp.ne.s32.totalorder %s1548_s18, %s1549_s27  ;;  %p1556_p9 = scmp.lt.s32.totalorder %s1554_s17, %s1549_s27 }
  0x40   : > { %p1552_p3 = pnand %p1550_p2, %p1491_p10  ;;  %p1557_p11 = por %p1556_p9, %p1555_p6 }
  0x42   : > { %p1553_p4 = pneg %p1552_p3 }
  0x44   : > { %p1558_p12 = pnand %p1557_p11, %p1553_p4 }
  0x46   : > { %1561 = shalt.err (!%p1558_p12)
}
  0x47   : > { %s2469_s19 = smov 32   ;;  %s2470_s20 = smov 512  }
  0x48   : > { %1412 = dma.hbm_to_vmem [thread:$0]  (!%p1710_p8), %s1746_s12, 2048, %s1748_s23, %s1722_s26, %s2470_s20, %s2470_s20, %s2469_s19  }
  0x49   : > { %353 = sbr.rel (%p1753_p5) target bundleno = 1045 (0x415), region = 48 }
  0x4e   : > { %s355_s22 = sand.u32 1, %s1607_s28  }
  0x4f   : > { %s1365_s30 = sshll.u32 %s355_s22, 9  ;;  %s356_s3 = scalar_lea.sflag [#allocation3], %s355_s22 }
  0x50   : > { %s1794_s25 = scalar_lea.vmem [#allocation2], %s1365_s30 }
  0x51   : > { %1594 = dma.done.wait (%p1703_p7), %s356_s3, 8192  }
  0x52   : > { %1596 = vsyncadd (%p1703_p7), %s356_s3, 4294959104  ;;  %s365_s16 = sand.u32 1, %s1686_s9   ;;  %s1366_s15 = sshll.u32 %s355_s22, 7 }
  0x53   : > { %s366_s26 = scalar_lea.sflag [#allocation5], %s365_s16  ;;  %s1801_s12 = scalar_lea.vmem [#allocation4], %s1366_s15 }
  0x54   : > { %1598 = dma.done.wait (%p1703_p7), %s366_s26, 4096  }
  0x55   : > { %1600 = vsyncadd (%p1703_p7), %s366_s26, 4294963200  ;;  %p429_p8 = scmp.lt.s32.totalorder %s1686_s9, 3  ;;  %s1826_s19 = scalar_lea.vmem [#allocation6], %s1366_s15 }
  0x56   : > { %p1370_p7 = scmp.ne.s32.totalorder %s1686_s9, 0 }
  0x57   : > { %s1809_s13 = scalar_select %p429_p8, %s1686_s9, 3 }
  0x58   : > { %443 = sbr.rel (%p1370_p7) target bundleno = 97 (0x61), region = 64 }
  0x59   : > { %s431_s18 = scalar_lea.vmem %s2421_s2, %s1809_s13  ;;  %s1368_s27 = sshll.u32 %s1809_s13, 2 }
  0x5a   : > { %s1819_s17 = scalar_lea.vmem %s2423_s4, %s1368_s27  ;;  %s1824_s11 = scalar_lea.vmem %s2425_s6, %s1368_s27 }
  0x5d   : > { %v444_v0 = vld [vmem:[%s2419_s0] sm:$0xff]  ;;  %v445_v1 = vld [vmem:[%s2419_s0 + $0x8] sm:$0xff]  ;;  %vm448_vm0 = vcmask 1024   ;;  %v1621_v2 = vmov 0.0  }
  0x5e   : > { %446 = vst [vmem:[%s2426_s7] sm:$0xff] %v444_v0 }
  0x5f   : > { %447 = vst [vmem:[%s2426_s7 + $0x8] sm:$0xff] %v445_v1 }
  0x60   : > { %449 = vst.msk [vmem:[%s2427_s8] sm:$0x3] %vm448_vm0, %v1621_v2 }
  0x61 PF: > { %v1845_v3 = vld [vmem:[%s1794_s25] sm:$0xff]  ;;  %v1848_v4 = vld [vmem:[%s1794_s25 + $0x8] sm:$0xff]  ;;  %v1851_v5 = vld [vmem:[%s1794_s25 + $0x10] sm:$0xff]  ;;  %p549_p10 = scmp.lt.s32.totalorder %s1686_s9, 0  ;;  %s550_s29 = ssub.s32 0, %s1686_s9 }
  0x62   : > { %2471 = vst [vmem:[#allocation12_spill] sm:$0xff] %v1845_v3  ;;  %v1856_v6 = vld [vmem:[%s1794_s25 + $0x18] sm:$0xff]  ;;  %v1859_v7 = vld [vmem:[%s1794_s25 + $0x20] sm:$0xff]  ;;  %v1862_v8 = vld [vmem:[%s1794_s25 + $0x28] sm:$0xff]  ;;  %s1371_s10 = smin.u32 %s1686_s9, %s550_s29 }
  0x63   : > { %2472 = vst [vmem:[#allocation13_spill] sm:$0xff] %v1848_v4  ;;  %v1866_v9 = vld [vmem:[%s1794_s25 + $0x30] sm:$0xff]  ;;  %v1869_v10 = vld [vmem:[%s1794_s25 + $0x38] sm:$0xff]  ;;  %v1872_v11 = vld [vmem:[%s1794_s25 + $0x40] sm:$0xff]  ;;  %s552_s24 = sand.u32 1, %s1371_s10  }
  0x64   : > { %2473 = vst [vmem:[#allocation14_spill] sm:$0xff] %v1851_v5  ;;  %v1875_v12 = vld [vmem:[%s1794_s25 + $0x48] sm:$0xff]  ;;  %v1878_v13 = vld [vmem:[%s1794_s25 + $0x50] sm:$0xff]  ;;  %v1881_v14 = vld [vmem:[%s1794_s25 + $0x58] sm:$0xff]  ;;  %s553_s14 = ssub.s32 0, %s552_s24 }
  0x65   : > { %2474 = vst [vmem:[#allocation15_spill] sm:$0xff] %v1856_v6  ;;  %v1884_v15 = vld [vmem:[%s1794_s25 + $0x60] sm:$0xff]  ;;  %v1887_v16 = vld [vmem:[%s1794_s25 + $0x68] sm:$0xff]  ;;  %v1890_v17 = vld [vmem:[%s1794_s25 + $0x70] sm:$0xff]  ;;  %s2633_s14 = smov (!%p549_p10, %s553_s14), %s552_s24 }
  0x66   : > { %2475 = vst [vmem:[#allocation16_spill] sm:$0xff] %v1859_v7  ;;  %v1895_v18 = vld [vmem:[%s1794_s25 + $0x78] sm:$0xff]  ;;  %v1898_v19 = vld [vmem:[%s1794_s25 + $0x80] sm:$0xff]  ;;  %v1901_v20 = vld [vmem:[%s1794_s25 + $0x88] sm:$0xff]  ;;  %p1373_p5 = scmp.lt.s32.totalorder %s2633_s14, 0  ;;  %s559_s9 = sadd.s32 2, %s2633_s14 }
  0x67   : > { %2476 = vst [vmem:[#allocation17_spill] sm:$0xff] %v1862_v8  ;;  %v1904_v21 = vld [vmem:[%s1794_s25 + $0x90] sm:$0xff]  ;;  %v1907_v22 = vld [vmem:[%s1794_s25 + $0x98] sm:$0xff]  ;;  %v1910_v23 = vld [vmem:[%s1794_s25 + $0xa0] sm:$0xff] }
  0x68   : > { %2477 = vst [vmem:[#allocation18_spill] sm:$0xff] %v1898_v19  ;;  %v1913_v24 = vld [vmem:[%s1794_s25 + $0xa8] sm:$0xff]  ;;  %v1916_v25 = vld [vmem:[%s1794_s25 + $0xb0] sm:$0xff]  ;;  %v1919_v26 = vld [vmem:[%s1794_s25 + $0xb8] sm:$0xff]  ;;  %s2635_s9 = smov (!%p1373_p5, %s559_s9), %s2633_s14 }
  0x69   : > { %2478 = vst [vmem:[#allocation19_spill] sm:$0xff] %v1901_v20  ;;  %v1922_v27 = vld [vmem:[%s1794_s25 + $0xc0] sm:$0xff]  ;;  %v1925_v28 = vld [vmem:[%s1794_s25 + $0xc8] sm:$0xff]  ;;  %v1928_v29 = vld [vmem:[%s1794_s25 + $0xd0] sm:$0xff]  ;;  %p1374_p13 = scmp.ne.s32.totalorder %s2635_s9, 0 }
  0x6a   : > { %2479 = vst [vmem:[#allocation20_spill] sm:$0xff] %v1904_v21  ;;  %v1933_v30 = vld [vmem:[%s1794_s25 + $0xd8] sm:$0xff]  ;;  %v1936_v31 = vld [vmem:[%s1794_s25 + $0xe0] sm:$0xff]  ;;  %v1939_v32 = vld [vmem:[%s1794_s25 + $0xe8] sm:$0xff] }
  0x6b   : > { %2480 = vst [vmem:[#allocation21_spill] sm:$0xff] %v1907_v22  ;;  %v1942_v33 = vld [vmem:[%s1794_s25 + $0xf0] sm:$0xff]  ;;  %v1945_v34 = vld [vmem:[%s1794_s25 + $0xf8] sm:$0xff]  ;;  %v1948_v35 = vld [vmem:[%s1794_s25 + $0x100] sm:$0xff] }
  0x6c   : > { %2481 = vst [vmem:[#allocation22_spill] sm:$0xff] %v1910_v23  ;;  %v1951_v36 = vld [vmem:[%s1794_s25 + $0x108] sm:$0xff]  ;;  %v1954_v37 = vld [vmem:[%s1794_s25 + $0x110] sm:$0xff]  ;;  %v1957_v38 = vld [vmem:[%s1794_s25 + $0x118] sm:$0xff] }
  0x6d   : > { %2482 = vst [vmem:[#allocation23_spill] sm:$0xff] %v1913_v24  ;;  %v1960_v39 = vld [vmem:[%s1794_s25 + $0x120] sm:$0xff]  ;;  %v1963_v40 = vld [vmem:[%s1794_s25 + $0x128] sm:$0xff]  ;;  %v1966_v41 = vld [vmem:[%s1794_s25 + $0x130] sm:$0xff] }
  0x6e   : > { %2483 = vst [vmem:[#allocation24_spill] sm:$0xff] %v1916_v25  ;;  %v1969_v42 = vld [vmem:[%s1794_s25 + $0x138] sm:$0xff]  ;;  %v1972_v43 = vld [vmem:[%s1794_s25 + $0x140] sm:$0xff]  ;;  %v1975_v44 = vld [vmem:[%s1794_s25 + $0x148] sm:$0xff] }
  0x6f   : > { %2484 = vst [vmem:[#allocation25_spill] sm:$0xff] %v1948_v35  ;;  %v1978_v45 = vld [vmem:[%s1794_s25 + $0x150] sm:$0xff]  ;;  %v1981_v46 = vld [vmem:[%s1794_s25 + $0x158] sm:$0xff]  ;;  %v1984_v47 = vld [vmem:[%s1794_s25 + $0x160] sm:$0xff] }
  0x70   : > { %2485 = vst [vmem:[#allocation26_spill] sm:$0xff] %v1951_v36  ;;  %v1987_v48 = vld [vmem:[%s1794_s25 + $0x168] sm:$0xff]  ;;  %v1990_v49 = vld [vmem:[%s1794_s25 + $0x170] sm:$0xff]  ;;  %v1993_v50 = vld [vmem:[%s1794_s25 + $0x178] sm:$0xff] }
  0x71   : > { %2486 = vst [vmem:[#allocation27_spill] sm:$0xff] %v1954_v37  ;;  %v1996_v51 = vld [vmem:[%s1794_s25 + $0x180] sm:$0xff]  ;;  %v1999_v52 = vld [vmem:[%s1794_s25 + $0x188] sm:$0xff]  ;;  %v2002_v53 = vld [vmem:[%s1794_s25 + $0x190] sm:$0xff] }
  0x72   : > { %2487 = vst [vmem:[#allocation28_spill] sm:$0xff] %v1957_v38  ;;  %v2005_v54 = vld [vmem:[%s1794_s25 + $0x198] sm:$0xff]  ;;  %v2008_v55 = vld [vmem:[%s1794_s25 + $0x1a0] sm:$0xff]  ;;  %v2011_v56 = vld [vmem:[%s1794_s25 + $0x1a8] sm:$0xff] }
  0x73   : > { %2488 = vst [vmem:[#allocation29_spill] sm:$0xff] %v1960_v39  ;;  %v2014_v57 = vld [vmem:[%s1794_s25 + $0x1b0] sm:$0xff]  ;;  %v2017_v58 = vld [vmem:[%s1794_s25 + $0x1b8] sm:$0xff]  ;;  %v2020_v59 = vld [vmem:[%s1794_s25 + $0x1c0] sm:$0xff] }
  0x74   : > { %2489 = vst [vmem:[#allocation30_spill] sm:$0xff] %v1963_v40  ;;  %v2023_v60 = vld [vmem:[%s1794_s25 + $0x1c8] sm:$0xff]  ;;  %v2026_v61 = vld [vmem:[%s1794_s25 + $0x1d0] sm:$0xff]  ;;  %v2029_v62 = vld [vmem:[%s1794_s25 + $0x1d8] sm:$0xff] }
  0x75   : > { %2490 = vst [vmem:[#allocation31_spill] sm:$0xff] %v1996_v51  ;;  %v2032_v63 = vld [vmem:[%s1794_s25 + $0x1e0] sm:$0xff]  ;;  %v2035_v0 = vld [vmem:[%s1794_s25 + $0x1e8] sm:$0xff]  ;;  %v2038_v1 = vld [vmem:[%s1794_s25 + $0x1f0] sm:$0xff] }
  0x76   : > { %2491 = vst [vmem:[#allocation32_spill] sm:$0xff] %v1999_v52  ;;  %v2041_v2 = vld [vmem:[%s1794_s25 + $0x1f8] sm:$0xff]  ;;  %v2051_v51 = vld [vmem:[%s1801_s12] sm:$0xff]  ;;  %v2054_v3 = vld [vmem:[%s1801_s12 + $0x8] sm:$0xff] }
  0x77   : > { %2492 = vst [vmem:[#allocation33_spill] sm:$0xff] %v2002_v53  ;;  %v2048_v19 = vld [vmem:[%s431_s18] sm:$0x1]  ;;  %v2057_v35 = vld [vmem:[%s1801_s12 + $0x10] sm:$0xff]  ;;  %v2063_v52 = vld [vmem:[%s1801_s12 + $0x20] sm:$0xff] }
  0x78   : > { %2493 = vst [vmem:[#allocation34_spill] sm:$0xff] %v2005_v54  ;;  %v2060_v20 = vld [vmem:[%s1801_s12 + $0x18] sm:$0xff]  ;;  %v2066_v4 = vld [vmem:[%s1801_s12 + $0x28] sm:$0xff]  ;;  %v2108_v36 = vld [vmem:[%s1826_s19 + $0x10] sm:$0xff] }
  0x79   : > { %2494 = vst [vmem:[#allocation35_spill] sm:$0xff] %v2008_v55  ;;  %v2117_v21 = vld [vmem:[%s1826_s19 + $0x28] sm:$0xff]  ;;  %v2126_v53 = vld [vmem:[%s1826_s19 + $0x40] sm:$0xff]  ;;  %v2135_v5 = vld [vmem:[%s1826_s19 + $0x58] sm:$0xff] }
  0x7a   : > { %2495 = vst [vmem:[#allocation36_spill] sm:$0xff] %v2011_v56 }
  0x7b   : > { %2496 = vst [vmem:[#allocation37_spill] sm:$0xff] %v2014_v57 }
  0x7c   : > { %2497 = vst [vmem:[#allocation38_spill] sm:$0xff] %v2048_v19  ;;  %v2069_v19 = vld [vmem:[%s1801_s12 + $0x30] sm:$0xff] }
  0x7d   : > { %2498 = vst [vmem:[#allocation39_spill] sm:$0xff] %v2051_v51  ;;  %v2072_v51 = vld [vmem:[%s1801_s12 + $0x38] sm:$0xff] }
  0x7e   : > { %2499 = vst [vmem:[#allocation40_spill] sm:$0xff] %v2054_v3  ;;  %v2075_v3 = vld [vmem:[%s1801_s12 + $0x40] sm:$0xff] }
  0x7f   : > { %2500 = vst [vmem:[#allocation41_spill] sm:$0xff] %v2057_v35  ;;  %v2078_v35 = vld [vmem:[%s1801_s12 + $0x48] sm:$0xff] }
  0x80   : > { %2501 = vst [vmem:[#allocation42_spill] sm:$0xff] %v2060_v20  ;;  %v2081_v20 = vld [vmem:[%s1801_s12 + $0x50] sm:$0xff] }
  0x81   : > { %2502 = vst [vmem:[#allocation43_spill] sm:$0xff] %v2063_v52  ;;  %v2084_v52 = vld [vmem:[%s1801_s12 + $0x58] sm:$0xff] }
  0x82   : > { %2503 = vst [vmem:[#allocation44_spill] sm:$0xff] %v2066_v4  ;;  %v2087_v4 = vld [vmem:[%s1801_s12 + $0x60] sm:$0xff] }
  0x83   : > { %2504 = vst [vmem:[#allocation45_spill] sm:$0xff] %v2069_v19  ;;  %v2090_v19 = vld [vmem:[%s1801_s12 + $0x68] sm:$0xff] }
  0x84   : > { %2505 = vst [vmem:[#allocation46_spill] sm:$0xff] %v2072_v51  ;;  %v2093_v51 = vld [vmem:[%s1801_s12 + $0x70] sm:$0xff] }
  0x85   : > { %2506 = vst [vmem:[#allocation47_spill] sm:$0xff] %v2075_v3  ;;  %v2096_v3 = vld [vmem:[%s1801_s12 + $0x78] sm:$0xff] }
  0x86   : > { %2507 = vst [vmem:[#allocation48_spill] sm:$0xff] %v2078_v35  ;;  %v2099_v35 = vld [vmem:[%s1819_s17] sm:$0xf] }
  0x87   : > { %2508 = vst [vmem:[#allocation49_spill] sm:$0xff] %v2081_v20  ;;  %v2102_v20 = vld [vmem:[%s1826_s19] sm:$0xff] }
  0x88   : > { %2509 = vst [vmem:[#allocation50_spill] sm:$0xff] %v2084_v52  ;;  %v2105_v52 = vld [vmem:[%s1826_s19 + $0x8] sm:$0xff] }
  0x89   : > { %2510 = vst [vmem:[#allocation51_spill] sm:$0xff] %v2087_v4  ;;  %v2111_v4 = vld [vmem:[%s1826_s19 + $0x18] sm:$0xff] }
  0x8a   : > { %2511 = vst [vmem:[#allocation52_spill] sm:$0xff] %v2090_v19  ;;  %v2114_v19 = vld [vmem:[%s1826_s19 + $0x20] sm:$0xff] }
  0x8b   : > { %2512 = vst [vmem:[#allocation53_spill] sm:$0xff] %v2093_v51  ;;  %v2120_v51 = vld [vmem:[%s1826_s19 + $0x30] sm:$0xff] }
  0x8c   : > { %2513 = vst [vmem:[#allocation54_spill] sm:$0xff] %v2096_v3  ;;  %v2123_v3 = vld [vmem:[%s1826_s19 + $0x38] sm:$0xff] }
  0x8d   : > { %2514 = vst [vmem:[#allocation55_spill] sm:$0xff] %v2099_v35  ;;  %v2129_v35 = vld [vmem:[%s1826_s19 + $0x48] sm:$0xff] }
  0x8e   : > { %2515 = vst [vmem:[#allocation56_spill] sm:$0xff] %v2102_v20  ;;  %v2132_v20 = vld [vmem:[%s1826_s19 + $0x50] sm:$0xff] }
  0x8f   : > { %2516 = vst [vmem:[#allocation57_spill] sm:$0xff] %v2105_v52  ;;  %v2138_v52 = vld [vmem:[%s1826_s19 + $0x60] sm:$0xff] }
  0x90   : > { %2517 = vst [vmem:[#allocation58_spill] sm:$0xff] %v2108_v36  ;;  %v2141_v36 = vld [vmem:[%s1826_s19 + $0x68] sm:$0xff] }
  0x91   : > { %2518 = vst [vmem:[#allocation59_spill] sm:$0xff] %v2111_v4  ;;  %v2144_v4 = vld [vmem:[%s1826_s19 + $0x70] sm:$0xff] }
  0x92   : > { %2519 = vst [vmem:[#allocation60_spill] sm:$0xff] %v2114_v19  ;;  %v2147_v19 = vld [vmem:[%s1826_s19 + $0x78] sm:$0xff] }
  0x93   : > { %2520 = vst [vmem:[#allocation61_spill] sm:$0xff] %v2117_v21  ;;  %v2150_v21 = vld [vmem:[%s1824_s11] sm:$0xf] }
  0x94   : > { %2521 = vst [vmem:[#allocation62_spill] sm:$0xff] %v2120_v51 }
  0x95   : > { %2522 = vst [vmem:[#allocation63_spill] sm:$0xff] %v2123_v3 }
  0x96   : > { %2523 = vst [vmem:[#allocation64_spill] sm:$0xff] %v2126_v53 }
  0x97   : > { %2524 = vst [vmem:[#allocation65_spill] sm:$0xff] %v2129_v35 }
  0x98   : > { %2525 = vst [vmem:[#allocation66_spill] sm:$0xff] %v2132_v20 }
  0x99   : > { %2526 = vst [vmem:[#allocation67_spill] sm:$0xff] %v2135_v5  ;;  %564 = sbr.rel (%p1374_p13) target bundleno = 598 (0x256), region = 68 }
  0x9a   : > { %2527 = vst [vmem:[#allocation68_spill] sm:$0xff] %v2138_v52 }
  0x9b   : > { %2528 = vst [vmem:[#allocation69_spill] sm:$0xff] %v2141_v36 }
  0x9c   : > { %2529 = vst [vmem:[#allocation70_spill] sm:$0xff] %v2144_v4 }
  0x9d   : > { %2530 = vst [vmem:[#allocation71_spill] sm:$0xff] %v2147_v19 }
  0x9e   : > { %620 = vmatpush.msra.mxu2 %v1993_v50  ;;  %580 = vmatpush.msra.mxu0 %v1895_v18  ;;  %v565_v3 = vld [vmem:[%s2426_s7] sm:$0xff]  ;;  %vm670_vm1 = vcmask 261120   ;;  %vm862_vm2 = vcmask 1041408   ;;  %vm864_vm3 = vcmask 1045508   ;;  %vm866_vm4 = vcmask 1043456  }
  0x9f   : > { %640 = vmatpush.msra.mxu3 %v2041_v2  ;;  %600 = vmatpush.msra.mxu1 %v1945_v34  ;;  %571 = vst [vmem:[#allocation1] ss:$4 sm:$0xff] %v565_v3  ;;  %v2531_v3 = vld [vmem:[#allocation14_spill] sm:$0xff]  ;;  %vm894_vm5 = vcmask 1024  }
  0xa0   : > { %621 = vmatpush.msra.mxu2 %v1990_v49  ;;  %581 = vmatpush.msra.mxu0 %v1890_v17 }
  0xa1   : > { %641 = vmatpush.msra.mxu3 %v2038_v1  ;;  %601 = vmatpush.msra.mxu1 %v1942_v33 }
  0xa2   : > { %622 = vmatpush.msra.mxu2 %v1987_v48  ;;  %582 = vmatpush.msra.mxu0 %v1887_v16 }
  0xa3   : > { %642 = vmatpush.msra.mxu3 %v2035_v0  ;;  %602 = vmatpush.msra.mxu1 %v1939_v32 }
  0xa4   : > { %623 = vmatpush.msra.mxu2 %v1984_v47  ;;  %583 = vmatpush.msra.mxu0 %v1884_v15 }
  0xa5   : > { %643 = vmatpush.msra.mxu3 %v2032_v63  ;;  %603 = vmatpush.msra.mxu1 %v1936_v31 }
  0xa6   : > { %624 = vmatpush.msra.mxu2 %v1981_v46  ;;  %584 = vmatpush.msra.mxu0 %v1881_v14 }
  0xa7   : > { %644 = vmatpush.msra.mxu3 %v2029_v62  ;;  %604 = vmatpush.msra.mxu1 %v1933_v30 }
  0xa8   : > { %625 = vmatpush.msra.mxu2 %v1978_v45  ;;  %585 = vmatpush.msra.mxu0 %v1878_v13 }
  0xa9   : > { %645 = vmatpush.msra.mxu3 %v2026_v61  ;;  %605 = vmatpush.msra.mxu1 %v1928_v29 }
  0xaa   : > { %626 = vmatpush.msra.mxu2 %v1975_v44  ;;  %586 = vmatpush.msra.mxu0 %v1875_v12 }
  0xab   : > { %646 = vmatpush.msra.mxu3 %v2023_v60  ;;  %606 = vmatpush.msra.mxu1 %v1925_v28 }
  0xac   : > { %627 = vmatpush.msra.mxu2 %v1972_v43  ;;  %587 = vmatpush.msra.mxu0 %v1872_v11 }
  0xad   : > { %647 = vmatpush.msra.mxu3 %v2020_v59  ;;  %607 = vmatpush.msra.mxu1 %v1922_v27 }
  0xae   : > { %628 = vmatpush.msra.mxu2 %v1969_v42  ;;  %588 = vmatpush.msra.mxu0 %v1869_v10 }
  0xaf   : > { %648 = vmatpush.msra.mxu3 %v2017_v58  ;;  %608 = vmatpush.msra.mxu1 %v1919_v26 }
  0xb0   : > { %629 = vmatpush.msra.mxu2 %v1966_v41  ;;  %589 = vmatpush.msra.mxu0 %v1866_v9 }
  0xb1   : > { %649 = vmatpush.msra.mxu3 %v2014_v57  ;;  %609 = vmatpush.msra.mxu1 %v1916_v25 }
  0xb2   : > { %630 = vmatpush.msra.mxu2 %v1963_v40  ;;  %590 = vmatpush.msra.mxu0 %v1862_v8  ;;  %v759_v8 = vperm.slane %v2150_v21, 0 }
  0xb3   : > { %650 = vmatpush.msra.mxu3 %v2011_v56  ;;  %610 = vmatpush.msra.mxu1 %v1913_v24  ;;  %v2532_v24 = vld [vmem:[#allocation33_spill] sm:$0xff]  ;;  %v575_v56 = vld.sshfl [vmem:[#allocation1 + $0x18] sm:$0xff pattern:$0x73625140] }
  0xb4   : > { %631 = vmatpush.msra.mxu2 %v1960_v39  ;;  %591 = vmatpush.msra.mxu0 %v1859_v7  ;;  %v2533_v39 = vld [vmem:[#allocation20_spill] sm:$0xff]  ;;  %v2534_v7 = vld [vmem:[#allocation26_spill] sm:$0xff] }
  0xb5   : > { %651 = vmatpush.msra.mxu3 %v2008_v55  ;;  %611 = vmatpush.msra.mxu1 %v1910_v23  ;;  %v2535_v55 = vld [vmem:[#allocation13_spill] sm:$0xff] }
  0xb6   : > { %632 = vmatpush.msra.mxu2 %v1957_v38  ;;  %592 = vmatpush.msra.mxu0 %v1856_v6  ;;  %v574_v23 = vld.sshfl [vmem:[#allocation1 + $0x10] sm:$0xff pattern:$0x73625140]  ;;  %v2536_v38 = vld [vmem:[#allocation32_spill] sm:$0xff]  ;;  %v2537_v6 = vld [vmem:[#allocation19_spill] sm:$0xff] }
  0xb7   : > { %652 = vmatpush.msra.mxu3 %v2005_v54  ;;  %612 = vmatpush.msra.mxu1 %v1907_v22  ;;  %v572_v54 = vld.sshfl [vmem:[#allocation1] sm:$0xff pattern:$0x73625140]  ;;  %v2538_v22 = vld [vmem:[#allocation25_spill] sm:$0xff] }
  0xb8   : > { %633 = vmatpush.msra.mxu2 %v1954_v37  ;;  %593 = vmatpush.msra.mxu0 %v2531_v3  ;;  %v2539_v37 = vld [vmem:[#allocation12_spill] sm:$0xff]  ;;  %v2540_v3 = vld [vmem:[#allocation31_spill] sm:$0xff] }
  0xb9   : > { %653 = vmatpush.msra.mxu3 %v2532_v24  ;;  %613 = vmatpush.msra.mxu1 %v2533_v39  ;;  %v573_v24 = vld.sshfl [vmem:[#allocation1 + $0x8] sm:$0xff pattern:$0x73625140]  ;;  %v2542_v39 = vld [vmem:[#allocation53_spill] sm:$0xff] }
  0xba   : > { %634 = vmatpush.msra.mxu2 %v2534_v7  ;;  %594 = vmatpush.msra.mxu0 %v2535_v55  ;;  %v2541_v7 = vld [vmem:[#allocation18_spill] sm:$0xff] }
  0xbb   : > { %654 = vmatpush.msra.mxu3 %v2536_v38  ;;  %614 = vmatpush.msra.mxu1 %v2537_v6  ;;  %v2543_v38 = vld [vmem:[#allocation51_spill] sm:$0xff]  ;;  %v2544_v6 = vld [vmem:[#allocation52_spill] sm:$0xff]  ;;  %v2545_v55 = vld [vmem:[#allocation54_spill] sm:$0xff] }
  0xbc   : > { %635 = vmatpush.msra.mxu2 %v2538_v22  ;;  %595 = vmatpush.msra.mxu0 %v2539_v37  ;;  %v2546_v22 = vld [vmem:[#allocation49_spill] sm:$0xff]  ;;  %v2547_v37 = vld [vmem:[#allocation47_spill] sm:$0xff] }
  0xbd   : > { %636 = vmatmul.f32.vlgmr.msra.gmra.mxu2 %v574_v23  ;;  %655 = vmatpush.msra.mxu3 %v2540_v3  ;;  %v2548_v23 = vld [vmem:[#allocation48_spill] sm:$0xff]  ;;  %v2549_v3 = vld [vmem:[#allocation50_spill] sm:$0xff] }
  0xbe   : > { %596 = vmatmul.f32.vlgmr.msra.gmra.mxu0 %v572_v54  ;;  %656 = vmatmul.f32.vlgmr.msra.gmra.mxu3 %v575_v56  ;;  %v2550_v54 = vld [vmem:[#allocation45_spill] sm:$0xff]  ;;  %v2551_v56 = vld [vmem:[#allocation43_spill] sm:$0xff] }
  0xbf   : > { %615 = vmatpush.msra.mxu1 %v2541_v7  ;;  %726 = vmatpush.msrb.mxu2 %v2542_v39  ;;  %v2552_v7 = vld [vmem:[#allocation44_spill] sm:$0xff]  ;;  %v2554_v39 = vld [vmem:[#allocation41_spill] sm:$0xff] }
  0xc0   : > { %616 = vmatmul.f32.vlgmr.msra.gmra.mxu1 %v573_v24  ;;  %686 = vmatpush.msrb.mxu0 %v2543_v38  ;;  %v2553_v24 = vld [vmem:[#allocation46_spill] sm:$0xff]  ;;  %v2555_v38 = vld [vmem:[#allocation39_spill] sm:$0xff] }
  0xc1   : > { %706 = vmatpush.msrb.mxu1 %v2544_v6  ;;  %746 = vmatpush.msrb.mxu3 %v2545_v55  ;;  %v2556_v6 = vld [vmem:[#allocation40_spill] sm:$0xff]  ;;  %v2557_v55 = vld [vmem:[#allocation42_spill] sm:$0xff] }
  0xc2   : > { %727 = vmatpush.msrb.mxu2 %v2546_v22  ;;  %687 = vmatpush.msrb.mxu0 %v2547_v37  ;;  %v2558_v22 = vld [vmem:[#allocation60_spill] sm:$0xff]  ;;  %v2559_v37 = vld [vmem:[#allocation61_spill] sm:$0xff] }
  0xc3   : > { %707 = vmatpush.msrb.mxu1 %v2548_v23  ;;  %747 = vmatpush.msrb.mxu3 %v2549_v3  ;;  %v2560_v23 = vld [vmem:[#allocation63_spill] sm:$0xff]  ;;  %v2561_v3 = vld [vmem:[#allocation56_spill] sm:$0xff] }
  0xc4   : > { %728 = vmatpush.msrb.mxu2 %v2550_v54  ;;  %688 = vmatpush.msrb.mxu0 %v2551_v56  ;;  %v2562_v54 = vld [vmem:[#allocation57_spill] sm:$0xff]  ;;  %v2563_v56 = vld [vmem:[#allocation58_spill] sm:$0xff] }
  0xc5   : > { %708 = vmatpush.msrb.mxu1 %v2552_v7  ;;  %748 = vmatpush.msrb.mxu3 %v2553_v24  ;;  %v2564_v7 = vld [vmem:[#allocation59_spill] sm:$0xff]  ;;  %v2565_v24 = vld [vmem:[#allocation38_spill] sm:$0xff] }
  0xc6   : > { %729 = vmatpush.msrb.mxu2 %v2554_v39  ;;  %689 = vmatpush.msrb.mxu0 %v2555_v38  ;;  %v568_v39 = vperm.slane %v2565_v24, 0 }
  0xc7   : > { %709 = vmatpush.msrb.mxu1 %v2556_v6  ;;  %749 = vmatpush.msrb.mxu3 %v2557_v55 }
  0xc8   : > { %779 = vmatpush.msra.mxu0 %v2138_v52  ;;  %819 = vmatpush.msra.mxu2 %v2144_v4 }
  0xc9   : > { %799 = vmatpush.msra.mxu1 %v2141_v36  ;;  %839 = vmatpush.msra.mxu3 %v2147_v19  ;;  %v760_v19 = vperm.slane %v2150_v21, 1 }
  0xca   : > { %780 = vmatpush.msra.mxu0 %v2126_v53  ;;  %820 = vmatpush.msra.mxu2 %v2132_v20 }
  0xcb   : > { %800 = vmatpush.msra.mxu1 %v2129_v35  ;;  %840 = vmatpush.msra.mxu3 %v2135_v5 }
  0xcc   : > { %781 = vmatpush.msra.mxu0 %v2558_v22  ;;  %821 = vmatpush.msra.mxu2 %v2120_v51 }
  0xcd   : > { %801 = vmatpush.msra.mxu1 %v2559_v37  ;;  %841 = vmatpush.msra.mxu3 %v2560_v23 }
  0xce   : > { %782 = vmatpush.msra.mxu0 %v2561_v3  ;;  %822 = vmatpush.msra.mxu2 %v2563_v56  ;;  %v2566_v3 = vld [vmem:[#allocation55_spill] sm:$0xff] }
  0xcf   : > { %802 = vmatpush.msra.mxu1 %v2562_v54  ;;  %842 = vmatpush.msra.mxu3 %v2564_v7  ;;  %v662_v54 = vperm.slane %v2566_v3, 0  ;;  %v663_v56 = vperm.slane %v2566_v3, 1 }
 0x13b   : > { %v597_v38 = vpop.f32.mrf.mxu0 }
 0x13c   : > { %v598_v6 = vadd.f32 %v597_v38, %v568_v39 }
 0x13d   : > { %v617_v55 = vpop.f32.mrf.mxu1 }
 0x13e   : > { %v618_v22 = vadd.f32 %v617_v55, %v598_v6 }
 0x140   : > { %v637_v5 = vpop.f32.mrf.mxu2 }
 0x141   : > { %v638_v37 = vadd.f32 %v637_v5, %v618_v22  ;;  %v657_v20 = vpop.f32.mrf.mxu3 }
 0x143   : > { %v658_v51 = vadd.f32 %v657_v20, %v638_v37  ;;  %v664_v20 = vperm.slane %v2566_v3, 2 }
 0x145   : > { %1451 = vtanh.f32 %v658_v51  ;;  %v665_v51 = vperm.slane %v2566_v3, 3  ;;  %v761_v3 = vperm.slane %v2150_v21, 2 }
 0x14b   : > { %v1452_v23 = vpop.eup %1451 }
 0x14c   : > { %1375 = vmatmul.msk.f32.vlgmr.msrb.gmra.mxu0 %vm670_vm1, %v1452_v23  ;;  %1376 = vmatmul.msk.f32.vlgmr.msrb.gmra.mxu1 %vm670_vm1, %v1452_v23 }
 0x14d   : > { %1377 = vmatmul.msk.f32.vlgmr.msrb.gmra.mxu2 %vm670_vm1, %v1452_v23  ;;  %1378 = vmatmul.msk.f32.vlgmr.msrb.gmra.mxu3 %vm670_vm1, %v1452_v23 }
 0x154   : > { %1379 = vmatmul.msk.f32.vlgmr.msra.gmra.mxu0 %vm670_vm1, %v1452_v23  ;;  %1380 = vmatmul.msk.f32.vlgmr.msra.gmra.mxu1 %vm670_vm1, %v1452_v23 }
 0x155   : > { %1381 = vmatmul.msk.f32.vlgmr.msra.gmra.mxu2 %vm670_vm1, %v1452_v23  ;;  %1382 = vmatmul.msk.f32.vlgmr.msra.gmra.mxu3 %vm670_vm1, %v1452_v23 }
 0x1c9   : > { %v691_v7 = vpop.f32.mrf.mxu0  ;;  %v711_v24 = vpop.f32.mrf.mxu1 }
 0x1ca   : > { %v692_v5 = vadd.f32 %v691_v7, %v662_v54  ;;  %v712_v39 = vadd.f32 %v711_v24, %v663_v56 }
 0x1cc   : > { %1453 = vtanh.f32 %v692_v5 }
 0x1cd   : > { %1455 = vtanh.f32 %v712_v39  ;;  %v762_v39 = vperm.slane %v2150_v21, 3 }
 0x1d0   : > { %v731_v38 = vpop.f32.mrf.mxu2  ;;  %v751_v6 = vpop.f32.mrf.mxu3 }
 0x1d1   : > { %v732_v55 = vadd.f32 %v731_v38, %v664_v20  ;;  %v752_v22 = vadd.f32 %v751_v6, %v665_v51  ;;  %v784_v25 = vpop.f32.mrf.mxu0 }
 0x1d2   : > { %v1454_v37 = vpop.eup %1453 }
 0x1d3   : > { %v1456_v23 = vpop.eup %1455  ;;  %1457 = vtanh.f32 %v732_v55  ;;  %v882_v53 = vsel %vm862_vm2, %v1454_v37, 0.0  ;;  %v847_v51 = vmul.f32 1.442695, %v1454_v37 }
 0x1d4   : > { %1459 = vtanh.f32 %v752_v22  ;;  %v849_v35 = vmul.f32 1.442695, %v1456_v23  ;;  %v883_v54 = vsel %vm862_vm2, %v1456_v23, 0.0 }
 0x1d5   : > { %v884_v7 = vadd.f32 %v883_v54, %v882_v53 }
 0x1d6   : > { %1461 = vpow2.f32 %v849_v35  ;;  %v804_v35 = vpop.f32.mrf.mxu1 }
 0x1d7   : > { %v805_v52 = vadd.f32 %v804_v35, %v760_v19 }
 0x1d8   : > { %v824_v6 = vpop.f32.mrf.mxu2  ;;  %v844_v55 = vpop.f32.mrf.mxu3 }
 0x1d9   : > { %v1458_v56 = vpop.eup %1457  ;;  %v825_v54 = vadd.f32 %v824_v6, %v761_v3  ;;  %v845_v4 = vadd.f32 %v844_v55, %v762_v39  ;;  %v566_v3 = vld [vmem:[%s2426_s7 + $0x8] sm:$0xff]  ;;  %v785_v39 = vadd.f32 %v784_v25, %v759_v8 }
 0x1da   : > { %v1460_v24 = vpop.eup %1459  ;;  %v851_v5 = vmul.f32 1.442695, %v1458_v56  ;;  %v885_v20 = vsel %vm862_vm2, %v1458_v56, 0.0 }
 0x1db   : > { %v853_v38 = vmul.f32 1.442695, %v1460_v24  ;;  %v886_v22 = vadd.f32 %v885_v20, %v884_v7  ;;  %v887_v23 = vsel %vm862_vm2, %v1460_v24, 0.0  ;;  %v875_v40 = vrot.slane %v825_v54, 4 }
 0x1dc   : > { %1463 = vpow2.f32 %v851_v5  ;;  %v1462_v36 = vpop.eup %1461  ;;  %v876_v7 = vrot.slane %v845_v4, 2 }
 0x1dd   : > { %1465 = vpow2.f32 %v853_v38  ;;  %v888_v53 = vadd.f32 %v887_v23, %v886_v22  ;;  %v859_v37 = vrot.slane %v1462_v36, 6  ;;  %v874_v38 = vrot.slane %v805_v52, 6  ;;  %v892_v52 = vld [vmem:[%s2427_s8] sm:$0x3] }
 0x1de   : > { %1467 = vpow2.f32 %v847_v51  ;;  %v878_v51 = vsel %vm864_vm3, %v875_v40, %v876_v7 }
 0x1df   : > { %889 = vadd.xlane.f32.xlu0 %v888_v53  ;;  %v877_v4 = vsel %vm862_vm2, %v785_v39, %v874_v38 }
 0x1e0   : > { %v879_v22 = vsel %vm866_vm4, %v877_v4, %v878_v51 }
 0x1e2   : > { %v1464_v56 = vpop.eup %1463 }
 0x1e3   : > { %v1466_v5 = vpop.eup %1465  ;;  %v860_v20 = vrot.slane %v1464_v56, 4 }
 0x1e4   : > { %v861_v24 = vrot.slane %v1466_v5, 2  ;;  %v1468_v57 = vpop.eup %1467 }
 0x1e5   : > { %v863_v19 = vsel %vm862_vm2, %v1468_v57, %v859_v37 }
 0x1e6   : > { %v865_v36 = vsel %vm864_vm3, %v860_v20, %v861_v24 }
 0x1e7   : > { %v867_v6 = vsel %vm866_vm4, %v863_v19, %v865_v36 }
 0x1e8   : > { %v869_v55 = vmul.f32 %v867_v6, %v566_v3 }
 0x1ea   : > { %v881_v23 = vadd.f32 %v879_v22, %v869_v55 }
 0x1ec   : > { %891 = vst [vmem:[%s2426_s7 + $0x8] sm:$0xff] %v881_v23 }
 0x252   : > { %v890_v35 = vpop.xlane.xlu0 %889 }
 0x253   : > { %v893_v8 = vadd.f32 %v892_v52, %v890_v35 }
 0x255   : > { %895 = vst.msk [vmem:[%s2427_s8] sm:$0x3] %vm894_vm5, %v893_v8 }
 0x256 PF: > { %p1383_p0 = scmp.ne.s32.totalorder %s2635_s9, 1 }
 0x258   : > { %899 = sbr.rel (%p1383_p0) target bundleno = 1045 (0x415), region = 72 }
 0x25d   : > { %955 = vmatpush.msra.mxu2 %v1993_v50  ;;  %915 = vmatpush.msra.mxu0 %v1895_v18  ;;  %v900_v25 = vld [vmem:[%s2426_s7 + $0x8] sm:$0xff]  ;;  %v2575_v18 = vld [vmem:[#allocation35_spill] sm:$0xff]  ;;  %v2586_v40 = vld [vmem:[#allocation13_spill] sm:$0xff]  ;;  %vm1005_vm6 = vcmask 261120   ;;  %vm1197_vm7 = vcmask 1041408   ;;  %vm1199_vm8 = vcmask 1045508  }
 0x25e   : > { %975 = vmatpush.msra.mxu3 %v2041_v2  ;;  %935 = vmatpush.msra.mxu1 %v1945_v34  ;;  %906 = vst [vmem:[#allocation1] ss:$4 sm:$0xff] %v900_v25  ;;  %v2585_v34 = vld [vmem:[#allocation26_spill] sm:$0xff]  ;;  %v2593_v57 = vld [vmem:[#allocation53_spill] sm:$0xff]  ;;  %v2602_v2 = vld [vmem:[#allocation43_spill] sm:$0xff]  ;;  %vm1201_vm9 = vcmask 1043456  }
 0x25f   : > { %956 = vmatpush.msra.mxu2 %v1990_v49  ;;  %916 = vmatpush.msra.mxu0 %v1890_v17  ;;  %v2574_v17 = vld [vmem:[#allocation16_spill] sm:$0xff]  ;;  %v2592_v50 = vld [vmem:[#allocation18_spill] sm:$0xff]  ;;  %v2605_v56 = vld [vmem:[#allocation41_spill] sm:$0xff]  ;;  %vm1229_vm10 = vcmask 1024  }
 0x260   : > { %976 = vmatpush.msra.mxu3 %v2038_v1  ;;  %936 = vmatpush.msra.mxu1 %v1942_v33  ;;  %v2584_v33 = vld [vmem:[#allocation20_spill] sm:$0xff]  ;;  %v2601_v1 = vld [vmem:[#allocation45_spill] sm:$0xff]  ;;  %v2604_v54 = vld [vmem:[#allocation46_spill] sm:$0xff] }
 0x261   : > { %957 = vmatpush.msra.mxu2 %v1987_v48  ;;  %917 = vmatpush.msra.mxu0 %v1887_v16  ;;  %v2572_v16 = vld [vmem:[#allocation23_spill] sm:$0xff]  ;;  %v2603_v53 = vld [vmem:[#allocation44_spill] sm:$0xff]  ;;  %v2608_v5 = vld [vmem:[#allocation42_spill] sm:$0xff] }
 0x262   : > { %977 = vmatpush.msra.mxu3 %v2035_v0  ;;  %937 = vmatpush.msra.mxu1 %v1939_v32  ;;  %v2583_v32 = vld [vmem:[#allocation33_spill] sm:$0xff]  ;;  %v2591_v48 = vld [vmem:[#allocation31_spill] sm:$0xff]  ;;  %v2600_v0 = vld [vmem:[#allocation50_spill] sm:$0xff] }
 0x263   : > { %958 = vmatpush.msra.mxu2 %v1984_v47  ;;  %918 = vmatpush.msra.mxu0 %v1884_v15  ;;  %v2571_v15 = vld [vmem:[#allocation36_spill] sm:$0xff]  ;;  %v2606_v37 = vld [vmem:[#allocation39_spill] sm:$0xff]  ;;  %v2610_v24 = vld [vmem:[#allocation69_spill] sm:$0xff] }
 0x264   : > { %978 = vmatpush.msra.mxu3 %v2032_v63  ;;  %938 = vmatpush.msra.mxu1 %v1936_v31  ;;  %v2582_v31 = vld [vmem:[#allocation14_spill] sm:$0xff]  ;;  %v2590_v47 = vld [vmem:[#allocation12_spill] sm:$0xff]  ;;  %v2612_v3 = vld [vmem:[#allocation71_spill] sm:$0xff] }
 0x265   : > { %959 = vmatpush.msra.mxu2 %v1981_v46  ;;  %919 = vmatpush.msra.mxu0 %v1881_v14  ;;  %v2570_v14 = vld [vmem:[#allocation17_spill] sm:$0xff]  ;;  %v908_v49 = vld.sshfl [vmem:[#allocation1 + $0x8] sm:$0xff pattern:$0x73625140]  ;;  %v2611_v38 = vld [vmem:[#allocation70_spill] sm:$0xff] }
 0x266   : > { %979 = vmatpush.msra.mxu3 %v2029_v62  ;;  %939 = vmatpush.msra.mxu1 %v1933_v30  ;;  %v2581_v30 = vld [vmem:[#allocation27_spill] sm:$0xff]  ;;  %v2589_v46 = vld [vmem:[#allocation25_spill] sm:$0xff]  ;;  %v2599_v63 = vld [vmem:[#allocation48_spill] sm:$0xff] }
 0x267   : > { %960 = vmatpush.msra.mxu2 %v1978_v45  ;;  %920 = vmatpush.msra.mxu0 %v1878_v13  ;;  %v2568_v13 = vld [vmem:[#allocation24_spill] sm:$0xff]  ;;  %v910_v45 = vld.sshfl [vmem:[#allocation1 + $0x18] sm:$0xff pattern:$0x73625140]  ;;  %v2598_v62 = vld [vmem:[#allocation47_spill] sm:$0xff] }
 0x268   : > { %980 = vmatpush.msra.mxu3 %v2026_v61  ;;  %940 = vmatpush.msra.mxu1 %v1928_v29  ;;  %v2580_v29 = vld [vmem:[#allocation21_spill] sm:$0xff]  ;;  %v2607_v7 = vld [vmem:[#allocation40_spill] sm:$0xff]  ;;  %v2615_v36 = vld [vmem:[#allocation66_spill] sm:$0xff] }
 0x269   : > { %961 = vmatpush.msra.mxu2 %v1975_v44  ;;  %921 = vmatpush.msra.mxu0 %v1875_v12  ;;  %v2567_v12 = vld [vmem:[#allocation37_spill] sm:$0xff]  ;;  %v907_v44 = vld.sshfl [vmem:[#allocation1] sm:$0xff pattern:$0x73625140]  ;;  %v2609_v20 = vld [vmem:[#allocation68_spill] sm:$0xff] }
 0x26a   : > { %981 = vmatpush.msra.mxu3 %v2023_v60  ;;  %941 = vmatpush.msra.mxu1 %v1925_v28  ;;  %v2579_v28 = vld [vmem:[#allocation34_spill] sm:$0xff]  ;;  %v2597_v61 = vld [vmem:[#allocation49_spill] sm:$0xff]  ;;  %v2613_v39 = vld [vmem:[#allocation64_spill] sm:$0xff] }
 0x26b   : > { %962 = vmatpush.msra.mxu2 %v1972_v43  ;;  %922 = vmatpush.msra.mxu0 %v1872_v11  ;;  %v2569_v11 = vld [vmem:[#allocation30_spill] sm:$0xff]  ;;  %v2588_v43 = vld [vmem:[#allocation19_spill] sm:$0xff]  ;;  %v2614_v19 = vld [vmem:[#allocation65_spill] sm:$0xff] }
 0x26c   : > { %982 = vmatpush.msra.mxu3 %v2020_v59  ;;  %942 = vmatpush.msra.mxu1 %v1922_v27  ;;  %v2578_v27 = vld [vmem:[#allocation15_spill] sm:$0xff]  ;;  %v2595_v59 = vld [vmem:[#allocation52_spill] sm:$0xff]  ;;  %v2596_v60 = vld [vmem:[#allocation54_spill] sm:$0xff] }
 0x26d   : > { %963 = vmatpush.msra.mxu2 %v1969_v42  ;;  %923 = vmatpush.msra.mxu0 %v1869_v10  ;;  %v2573_v10 = vld [vmem:[#allocation29_spill] sm:$0xff]  ;;  %v2587_v42 = vld [vmem:[#allocation32_spill] sm:$0xff]  ;;  %v2616_v51 = vld [vmem:[#allocation67_spill] sm:$0xff] }
 0x26e   : > { %983 = vmatpush.msra.mxu3 %v2017_v58  ;;  %943 = vmatpush.msra.mxu1 %v1919_v26  ;;  %v2576_v26 = vld [vmem:[#allocation22_spill] sm:$0xff]  ;;  %v2594_v58 = vld [vmem:[#allocation51_spill] sm:$0xff]  ;;  %v2617_v6 = vld [vmem:[#allocation60_spill] sm:$0xff] }
 0x26f   : > { %964 = vmatpush.msra.mxu2 %v1966_v41  ;;  %924 = vmatpush.msra.mxu0 %v1866_v9  ;;  %v2577_v9 = vld [vmem:[#allocation28_spill] sm:$0xff]  ;;  %v909_v41 = vld.sshfl [vmem:[#allocation1 + $0x10] sm:$0xff pattern:$0x73625140]  ;;  %v2619_v55 = vld [vmem:[#allocation62_spill] sm:$0xff] }
 0x270   : > { %984 = vmatpush.msra.mxu3 %v2567_v12  ;;  %944 = vmatpush.msra.mxu1 %v2568_v13  ;;  %v2618_v4 = vld [vmem:[#allocation61_spill] sm:$0xff]  ;;  %v2620_v22 = vld [vmem:[#allocation63_spill] sm:$0xff]  ;;  %v2621_v23 = vld [vmem:[#allocation56_spill] sm:$0xff] }
 0x271   : > { %965 = vmatpush.msra.mxu2 %v2569_v11  ;;  %925 = vmatpush.msra.mxu0 %v2570_v14  ;;  %v2622_v52 = vld [vmem:[#allocation57_spill] sm:$0xff]  ;;  %v2623_v35 = vld [vmem:[#allocation58_spill] sm:$0xff]  ;;  %v2624_v8 = vld [vmem:[#allocation59_spill] sm:$0xff] }
 0x272   : > { %985 = vmatpush.msra.mxu3 %v2571_v15  ;;  %945 = vmatpush.msra.mxu1 %v2572_v16  ;;  %v2625_v25 = vld [vmem:[#allocation38_spill] sm:$0xff] }
 0x273   : > { %966 = vmatpush.msra.mxu2 %v2573_v10  ;;  %926 = vmatpush.msra.mxu0 %v2574_v17  ;;  %v903_v12 = vperm.slane %v2625_v25, 0 }
 0x274   : > { %986 = vmatpush.msra.mxu3 %v2575_v18  ;;  %946 = vmatpush.msra.mxu1 %v2576_v26 }
 0x275   : > { %967 = vmatpush.msra.mxu2 %v2577_v9  ;;  %927 = vmatpush.msra.mxu0 %v2578_v27  ;;  %v2626_v9 = vld [vmem:[#allocation55_spill] sm:$0xff] }
 0x276   : > { %987 = vmatpush.msra.mxu3 %v2579_v28  ;;  %947 = vmatpush.msra.mxu1 %v2580_v29  ;;  %v997_v27 = vperm.slane %v2626_v9, 0  ;;  %v998_v28 = vperm.slane %v2626_v9, 1 }
 0x277   : > { %968 = vmatpush.msra.mxu2 %v2581_v30  ;;  %928 = vmatpush.msra.mxu0 %v2582_v31 }
 0x278   : > { %988 = vmatpush.msra.mxu3 %v2583_v32  ;;  %948 = vmatpush.msra.mxu1 %v2584_v33  ;;  %v999_v33 = vperm.slane %v2626_v9, 2 }
 0x279   : > { %969 = vmatpush.msra.mxu2 %v2585_v34  ;;  %929 = vmatpush.msra.mxu0 %v2586_v40  ;;  %v1000_v34 = vperm.slane %v2626_v9, 3 }
 0x27a   : > { %989 = vmatpush.msra.mxu3 %v2587_v42  ;;  %949 = vmatpush.msra.mxu1 %v2588_v43 }
 0x27b   : > { %970 = vmatpush.msra.mxu2 %v2589_v46  ;;  %930 = vmatpush.msra.mxu0 %v2590_v47 }
 0x27c   : > { %971 = vmatmul.f32.vlgmr.msra.gmra.mxu2 %v909_v41  ;;  %990 = vmatpush.msra.mxu3 %v2591_v48 }
 0x27d   : > { %931 = vmatmul.f32.vlgmr.msra.gmra.mxu0 %v907_v44  ;;  %991 = vmatmul.f32.vlgmr.msra.gmra.mxu3 %v910_v45 }
 0x27e   : > { %950 = vmatpush.msra.mxu1 %v2592_v50  ;;  %1061 = vmatpush.msrb.mxu2 %v2593_v57 }
 0x27f   : > { %951 = vmatmul.f32.vlgmr.msra.gmra.mxu1 %v908_v49  ;;  %1021 = vmatpush.msrb.mxu0 %v2594_v58 }
 0x280   : > { %1041 = vmatpush.msrb.mxu1 %v2595_v59  ;;  %1081 = vmatpush.msrb.mxu3 %v2596_v60  ;;  %v1096_v59 = vperm.slane %v2150_v21, 2  ;;  %v1097_v60 = vperm.slane %v2150_v21, 3 }
 0x281   : > { %1062 = vmatpush.msrb.mxu2 %v2597_v61  ;;  %1022 = vmatpush.msrb.mxu0 %v2598_v62 }
 0x282   : > { %1042 = vmatpush.msrb.mxu1 %v2599_v63  ;;  %1082 = vmatpush.msrb.mxu3 %v2600_v0 }
 0x283   : > { %1063 = vmatpush.msrb.mxu2 %v2601_v1  ;;  %1023 = vmatpush.msrb.mxu0 %v2602_v2 }
 0x284   : > { %1043 = vmatpush.msrb.mxu1 %v2603_v53  ;;  %1083 = vmatpush.msrb.mxu3 %v2604_v54  ;;  %v1095_v53 = vperm.slane %v2150_v21, 1 }
 0x285   : > { %1064 = vmatpush.msrb.mxu2 %v2605_v56  ;;  %1024 = vmatpush.msrb.mxu0 %v2606_v37 }
 0x286   : > { %1044 = vmatpush.msrb.mxu1 %v2607_v7  ;;  %1084 = vmatpush.msrb.mxu3 %v2608_v5 }
 0x287   : > { %1114 = vmatpush.msra.mxu0 %v2609_v20  ;;  %1154 = vmatpush.msra.mxu2 %v2611_v38 }
 0x288   : > { %1134 = vmatpush.msra.mxu1 %v2610_v24  ;;  %1174 = vmatpush.msra.mxu3 %v2612_v3 }
 0x289   : > { %1115 = vmatpush.msra.mxu0 %v2613_v39  ;;  %1155 = vmatpush.msra.mxu2 %v2615_v36  ;;  %v1094_v39 = vperm.slane %v2150_v21, 0 }
 0x28a   : > { %1135 = vmatpush.msra.mxu1 %v2614_v19  ;;  %1175 = vmatpush.msra.mxu3 %v2616_v51 }
 0x28b   : > { %1116 = vmatpush.msra.mxu0 %v2617_v6  ;;  %1156 = vmatpush.msra.mxu2 %v2619_v55 }
 0x28c   : > { %1136 = vmatpush.msra.mxu1 %v2618_v4  ;;  %1176 = vmatpush.msra.mxu3 %v2620_v22 }
 0x28d   : > { %1117 = vmatpush.msra.mxu0 %v2621_v23  ;;  %1157 = vmatpush.msra.mxu2 %v2623_v35 }
 0x28e   : > { %1137 = vmatpush.msra.mxu1 %v2622_v52  ;;  %1177 = vmatpush.msra.mxu3 %v2624_v8  ;;  %v901_v52 = vld [vmem:[%s2426_s7] sm:$0xff] }
 0x2fa   : > { %v932_v13 = vpop.f32.mrf.mxu0 }
 0x2fb   : > { %v933_v11 = vadd.f32 %v932_v13, %v903_v12 }
 0x2fc   : > { %v952_v14 = vpop.f32.mrf.mxu1 }
 0x2fd   : > { %v953_v15 = vadd.f32 %v952_v14, %v933_v11 }
 0x2ff   : > { %v972_v16 = vpop.f32.mrf.mxu2 }
 0x300   : > { %v973_v10 = vadd.f32 %v972_v16, %v953_v15  ;;  %v992_v17 = vpop.f32.mrf.mxu3  ;;  %v1227_v16 = vld [vmem:[%s2427_s8] sm:$0x3] }
 0x302   : > { %v993_v18 = vadd.f32 %v992_v17, %v973_v10 }
 0x304   : > { %1469 = vtanh.f32 %v993_v18 }
 0x30a   : > { %v1470_v26 = vpop.eup %1469 }
 0x30b   : > { %1384 = vmatmul.msk.f32.vlgmr.msrb.gmra.mxu0 %vm1005_vm6, %v1470_v26  ;;  %1385 = vmatmul.msk.f32.vlgmr.msrb.gmra.mxu1 %vm1005_vm6, %v1470_v26 }
 0x30c   : > { %1386 = vmatmul.msk.f32.vlgmr.msrb.gmra.mxu2 %vm1005_vm6, %v1470_v26  ;;  %1387 = vmatmul.msk.f32.vlgmr.msrb.gmra.mxu3 %vm1005_vm6, %v1470_v26 }
 0x313   : > { %1388 = vmatmul.msk.f32.vlgmr.msra.gmra.mxu0 %vm1005_vm6, %v1470_v26  ;;  %1389 = vmatmul.msk.f32.vlgmr.msra.gmra.mxu1 %vm1005_vm6, %v1470_v26 }
 0x314   : > { %1390 = vmatmul.msk.f32.vlgmr.msra.gmra.mxu2 %vm1005_vm6, %v1470_v26  ;;  %1391 = vmatmul.msk.f32.vlgmr.msra.gmra.mxu3 %vm1005_vm6, %v1470_v26 }
 0x388   : > { %v1026_v29 = vpop.f32.mrf.mxu0  ;;  %v1046_v30 = vpop.f32.mrf.mxu1 }
 0x389   : > { %v1027_v31 = vadd.f32 %v1026_v29, %v997_v27  ;;  %v1047_v32 = vadd.f32 %v1046_v30, %v998_v28 }
 0x38b   : > { %1471 = vtanh.f32 %v1027_v31 }
 0x38c   : > { %1473 = vtanh.f32 %v1047_v32 }
 0x38f   : > { %v1066_v40 = vpop.f32.mrf.mxu2  ;;  %v1086_v41 = vpop.f32.mrf.mxu3 }
 0x390   : > { %v1067_v42 = vadd.f32 %v1066_v40, %v999_v33  ;;  %v1087_v43 = vadd.f32 %v1086_v41, %v1000_v34  ;;  %v1139_v56 = vpop.f32.mrf.mxu1  ;;  %v1119_v4 = vpop.f32.mrf.mxu0 }
 0x391   : > { %v1472_v44 = vpop.eup %1471  ;;  %v1140_v24 = vadd.f32 %v1139_v56, %v1095_v53  ;;  %v1120_v35 = vadd.f32 %v1119_v4, %v1094_v39 }
 0x392   : > { %v1474_v45 = vpop.eup %1473  ;;  %1475 = vtanh.f32 %v1067_v42  ;;  %v1217_v47 = vsel %vm1197_vm7, %v1472_v44, 0.0  ;;  %v1182_v62 = vmul.f32 1.442695, %v1472_v44 }
 0x393   : > { %1477 = vtanh.f32 %v1087_v43  ;;  %v1184_v46 = vmul.f32 1.442695, %v1474_v45  ;;  %v1218_v48 = vsel %vm1197_vm7, %v1474_v45, 0.0  ;;  %v1209_v22 = vrot.slane %v1140_v24, 6 }
 0x394   : > { %v1219_v50 = vadd.f32 %v1218_v48, %v1217_v47 }
 0x395   : > { %1479 = vpow2.f32 %v1184_v46  ;;  %v1212_v13 = vsel %vm1197_vm7, %v1120_v35, %v1209_v22 }
 0x397   : > { %v1159_v0 = vpop.f32.mrf.mxu2  ;;  %v1179_v1 = vpop.f32.mrf.mxu3 }
 0x398   : > { %v1476_v49 = vpop.eup %1475  ;;  %v1160_v7 = vadd.f32 %v1159_v0, %v1096_v59  ;;  %v1180_v5 = vadd.f32 %v1179_v1, %v1097_v60 }
 0x399   : > { %v1478_v57 = vpop.eup %1477  ;;  %v1186_v58 = vmul.f32 1.442695, %v1476_v49  ;;  %v1220_v61 = vsel %vm1197_vm7, %v1476_v49, 0.0 }
 0x39a   : > { %v1188_v63 = vmul.f32 1.442695, %v1478_v57  ;;  %v1221_v2 = vadd.f32 %v1220_v61, %v1219_v50  ;;  %v1222_v54 = vsel %vm1197_vm7, %v1478_v57, 0.0  ;;  %v1210_v19 = vrot.slane %v1160_v7, 4 }
 0x39b   : > { %1481 = vpow2.f32 %v1186_v58  ;;  %v1480_v20 = vpop.eup %1479  ;;  %v1211_v36 = vrot.slane %v1180_v5, 2 }
 0x39c   : > { %1483 = vpow2.f32 %v1188_v63  ;;  %v1223_v37 = vadd.f32 %v1222_v54, %v1221_v2  ;;  %v1194_v3 = vrot.slane %v1480_v20, 6 }
 0x39d   : > { %1485 = vpow2.f32 %v1182_v62  ;;  %v1213_v12 = vsel %vm1199_vm8, %v1210_v19, %v1211_v36 }
 0x39e   : > { %1224 = vadd.xlane.f32.xlu0 %v1223_v37  ;;  %v1214_v14 = vsel %vm1201_vm9, %v1212_v13, %v1213_v12 }
 0x3a1   : > { %v1482_v38 = vpop.eup %1481 }
 0x3a2   : > { %v1484_v51 = vpop.eup %1483  ;;  %v1195_v6 = vrot.slane %v1482_v38, 4 }
 0x3a3   : > { %v1196_v55 = vrot.slane %v1484_v51, 2  ;;  %v1486_v23 = vpop.eup %1485 }
 0x3a4   : > { %v1198_v8 = vsel %vm1197_vm7, %v1486_v23, %v1194_v3 }
 0x3a5   : > { %v1200_v25 = vsel %vm1199_vm8, %v1195_v6, %v1196_v55 }
 0x3a6   : > { %v1202_v21 = vsel %vm1201_vm9, %v1198_v8, %v1200_v25 }
 0x3a7   : > { %v1204_v11 = vmul.f32 %v1202_v21, %v901_v52 }
 0x3a9   : > { %v1216_v15 = vadd.f32 %v1214_v14, %v1204_v11 }
 0x3ab   : > { %1226 = vst [vmem:[%s2426_s7] sm:$0xff] %v1216_v15 }
 0x411   : > { %v1225_v10 = vpop.xlane.xlu0 %1224 }
 0x412   : > { %v1228_v17 = vadd.f32 %v1227_v16, %v1225_v10 }
 0x414   : > { %1230 = vst.msk [vmem:[%s2427_s8] sm:$0x3] %vm1229_vm10, %v1228_v17 }
 0x415 PF: > { %s2627_s30 = sld [smem:[#allocation10_spill]]  ;;  %s2630_s27 = smov %s1607_s28 }
 0x416   : > { %s2628_s20 = sld [smem:[#allocation9_spill]] }
 0x417   : > { %s2629_s29 = sld [smem:[#allocation11_spill]] }
 0x41b   : > { %p22_p1 = scmp.ge.s32.totalorder %s2627_s30, 6  }
 0x41c   : > { %s2631_s28 = smov %s2628_s20 }
 0x41d   :  { %24 = sbr.rel (!%p22_p1) target bundleno = 7 (0x7), region = 137 }
 0x422   :  { %1248 = vsyncpa [#allocation3], 1 }
 0x423   :  { %1250 = vsyncpa [#allocation3 + $0x1], 1 }
 0x424   :  { %1251 = vsyncpa [#allocation5], 1 }
 0x425   :  { %1253 = vsyncpa [#allocation5 + $0x1], 1 }

</bundles_post_ra>
